<compile_context>
chip_gen: v7x
topology: tpu7x:2x2x1
jax: 0.10.0
libtpu: 0.0.40
codegen_flags: <defaults>
</compile_context>

<pallas_src>
import jax
import jax.numpy as jnp
from jax.experimental import pallas as pl
from jax.experimental.pallas import tpu as pltpu


# ---------------------------------------------------------------------------
# Pass 1: per-tile conv (single K = 9*Cin MXU contraction) + partial BN sums.
# ---------------------------------------------------------------------------
def _conv_stats_kernel(p_ref, w_ref, stat_ref):
    # p_ref:    (TM, K)     bf16  im2col rows (one row per conv output pixel)
    # w_ref:    (K, Cp)     bf16  conv weights, Cout zero-padded to Cp
    # stat_ref: (1, 2, Cp)  f32   [sum(acc), sum(acc*acc)] over this tile's rows
    acc = jnp.dot(p_ref[...], w_ref[...], preferred_element_type=jnp.float32)
    s1 = jnp.sum(acc, axis=0, keepdims=True)           # (1, Cp)
    s2 = jnp.sum(acc * acc, axis=0, keepdims=True)      # (1, Cp)
    stat_ref[...] = jnp.concatenate([s1, s2], axis=0)[None]


# ---------------------------------------------------------------------------
# Pass 2: recompute conv tile, folded-BN affine + SiLU + 2x2 max-pool,
#         lane-dense (TH, Wh, Cp) store.
# ---------------------------------------------------------------------------
def _conv_bn_silu_pool_kernel(p_ref, w_ref, scale_ref, shift_ref, out_ref):
    # p_ref:     (TH*2*W, K)   bf16  rows ordered (out_row, h%2, w)
    # w_ref:     (K, Cp)       bf16
    # scale_ref: (1, Cp)       f32   gamma / sqrt(var + eps)
    # shift_ref: (1, Cp)       f32   beta - mean * scale
    # out_ref:   (TH, Wh, Cp)  f32   pooled rows, full 128-lane-wide stores
    TH, Wh, Cp = out_ref.shape
    acc = jnp.dot(p_ref[...], w_ref[...], preferred_element_type=jnp.float32)
    y = acc * scale_ref[...] + shift_ref[...]            # folded BatchNorm affine
    y = y * jax.nn.sigmoid(y)                            # SiLU (sigmoid -> EUP)
    # MaxPool2d(2), W direction: adjacent conv rows are the (w, w+1) pairs.
    y = jnp.max(y.reshape(TH * 2 * Wh, 2, Cp), axis=1)   # (TH*2*Wh, Cp)
    # MaxPool2d(2), H direction: regroup rows (minor dim untouched; 8-aligned row
    # blocks) and max the even-h / odd-h halves.
    y = y.reshape(TH, 2, Wh, Cp)
    out_ref[...] = jnp.maximum(y[:, 0], y[:, 1])         # (TH, Wh, Cp)


def _pick_tile(total, cap):
    """Largest divisor of `total` that is a multiple of 8 and <= cap (else total)."""
    if total <= cap:
        return total
    for t in range(cap, 7, -1):
        if total % t == 0 and t % 8 == 0:
            return t
    return total  # no aligned divisor: fall back to a single whole-problem tile


def conv_block(x_nchw, w_oihw, gamma, beta, *, eps=1e-5,
               stats_tile_cap=256, out_row_tile_cap=8):
    """Pallas ConvBlock forward.  Inputs in PyTorch NCHW / OIHW, output NCHW.

    The small default tile caps keep even the demo shapes on multi-step grids;
    raise them for large inputs (each pass-1 block is tile x 9*Cin bf16, each
    pass-2 block is tile*2*W x 9*Cin bf16 plus a tile x W/2 x Cp f32 output).
    """
    N, Cin, H, W = x_nchw.shape
    Cout = w_oihw.shape[0]
    if (H % 2) or (W % 2):
        raise ValueError("fused MaxPool2d(2) path requires even H and W")
    Hh, Wh = H // 2, W // 2
    K = 9 * Cin
    Cp = ((Cout + 127) // 128) * 128          # lane-dense channel padding
    n_pix = N * H * W                         # conv outputs entering BN stats
    n_rows = N * Hh                           # pooled output rows (n, hh)

    # --- wrapper-side layout plumbing (fused by XLA with the mandatory NCHW->NHWC
    #     transpose): bf16 cast on the 1x input, halo pad, im2col.  The kernels'
    #     LHS arrives lane-contiguous with K = 9*Cin; no in-kernel gathers/concats.
    #     TODO(synk): for large Cin move the im2col back in-kernel (contiguous W
    #     taps) to avoid the 9x patch expansion in HBM.
    x_pad = jnp.pad(jnp.transpose(x_nchw, (0, 2, 3, 1)).astype(jnp.bfloat16),
                    ((0, 0), (1, 1), (1, 1), (0, 0)))
    patches = jnp.concatenate(
        [x_pad[:, kh:kh + H, kw:kw + W, :] for kh in range(3) for kw in range(3)],
        axis=-1).reshape(n_pix, K)                               # (n_pix, 9*Cin) bf16

    # OIHW -> rows ordered (kh, kw, cin); Cout zero-padded to Cp; bf16 for the MXU.
    w_mat = jnp.transpose(w_oihw, (2, 3, 1, 0)).reshape(K, Cout)
    w_mat = jnp.pad(w_mat, ((0, 0), (0, Cp - Cout))).astype(jnp.bfloat16)
    gamma_p = jnp.pad(gamma.reshape(1, Cout).astype(jnp.float32),
                      ((0, 0), (0, Cp - Cout)))
    beta_p = jnp.pad(beta.reshape(1, Cout).astype(jnp.float32),
                     ((0, 0), (0, Cp - Cout)))

    # Tiled design keeps per-block VMEM tiny; 32 MiB scoped limit is plenty on all
    # of v5e / v6e / v7x (raise tile caps + this limit together for huge inputs).
    cparams = pltpu.CompilerParams(dimension_semantics=("parallel",),
                                   vmem_limit_bytes=32 * 1024 * 1024)

    # ---- pass 1: conv + per-tile partial BN sums, tiled over conv output pixels.
    tm = _pick_tile(n_pix, stats_tile_cap)
    n_t1 = n_pix // tm
    part = pl.pallas_call(
        _conv_stats_kernel,
        out_shape=jax.ShapeDtypeStruct((n_t1, 2, Cp), jnp.float32),
        grid=(n_t1,),
        in_specs=[pl.BlockSpec((tm, K), lambda i: (i, 0)),
                  pl.BlockSpec((K, Cp), lambda i: (0, 0))],
        out_specs=pl.BlockSpec((1, 2, Cp), lambda i: (i, 0, 0)),
        compiler_params=cparams,
    )(patches, w_mat)

    # ---- fold training-mode batch stats into one per-channel scale / shift.
    s = jnp.sum(part, axis=0)                                    # (2, Cp)
    mean = s[0] * (1.0 / n_pix)
    var = jnp.maximum(s[1] * (1.0 / n_pix) - mean * mean, 0.0)   # clamp: no NaN
    inv_std = jax.lax.rsqrt(var + eps)
    scale = gamma_p * inv_std                                    # (1, Cp)
    shift = beta_p - mean * scale                                # (1, Cp)
    # TODO(synk): BatchNorm running_mean/running_var momentum updates (training-time
    # buffer side effect) are not reproduced; they do not affect the returned tensor.

    # ---- pass 2: recompute conv tile, BN affine + SiLU + 2x2 max-pool,
    #      lane-dense (n_rows, Wh, Cp) output (output row r uses conv rows
    #      [2*r*W, 2*(r+1)*W), so row tiles map to contiguous patch-row blocks).
    th = _pick_tile(n_rows, out_row_tile_cap)
    n_t2 = n_rows // th
    rows_per_tile = th * 2 * W
    out3d = pl.pallas_call(
        _conv_bn_silu_pool_kernel,
        out_shape=jax.ShapeDtypeStruct((n_rows, Wh, Cp), jnp.float32),
        grid=(n_t2,),
        in_specs=[pl.BlockSpec((rows_per_tile, K), lambda i: (i, 0)),
                  pl.BlockSpec((K, Cp), lambda i: (0, 0)),
                  pl.BlockSpec((1, Cp), lambda i: (0, 0)),
                  pl.BlockSpec((1, Cp), lambda i: (0, 0))],
        out_specs=pl.BlockSpec((th, Wh, Cp), lambda i: (i, 0, 0)),
        compiler_params=cparams,
    )(patches, w_mat, scale, shift)

    out_nhwc = out3d[:, :, :Cout].reshape(N, Hh, Wh, Cout)
    return jnp.transpose(out_nhwc, (0, 3, 1, 2))                 # back to NCHW


def ref_forward(x_nchw, w_oihw, gamma, beta, eps=1e-5):
    """Plain-JAX reference of the PyTorch ConvBlock forward (training-mode BN)."""
    y = jax.lax.conv_general_dilated(
        x_nchw, w_oihw, window_strides=(1, 1), padding=((1, 1), (1, 1)),
        dimension_numbers=("NCHW", "OIHW", "NCHW"),
        precision=jax.lax.Precision.HIGHEST)
    mean = y.mean(axis=(0, 2, 3), keepdims=True)
    var = ((y - mean) ** 2).mean(axis=(0, 2, 3), keepdims=True)
    y = (y - mean) / jnp.sqrt(var + eps)
    y = y * gamma.reshape(1, -1, 1, 1) + beta.reshape(1, -1, 1, 1)
    y = y * jax.nn.sigmoid(y)
    y = jax.lax.reduce_window(y, -jnp.inf, jax.lax.max,
                              (1, 1, 2, 2), (1, 1, 2, 2), "VALID")
    return y


if __name__ == "__main__":
    key = jax.random.PRNGKey(0)
    kx, kw = jax.random.split(key)

    # Small shapes consistent with the module: N=2, Cin=4, H=W=16, Cout=16.
    x = jax.random.normal(kx, (2, 4, 16, 16), jnp.float32)
    conv_w = jax.random.normal(kw, (16, 4, 3, 3), jnp.float32) * 0.1  # OIHW, no bias
    bn_gamma = jnp.ones((16,), jnp.float32)   # PyTorch BatchNorm2d default init
    bn_beta = jnp.zeros((16,), jnp.float32)

    out = jax.jit(conv_block)(x, conv_w, bn_gamma, bn_beta)
    out = jax.block_until_ready(out)

    ref = ref_forward(x, conv_w, bn_gamma, bn_beta)
    max_err = float(jnp.max(jnp.abs(out - ref)))
    # Tolerance reflects bf16 MXU conv operands vs the f32-HIGHEST reference conv.
    if out.shape != ref.shape or not jnp.allclose(out, ref, rtol=3e-2, atol=3e-2):
        raise AssertionError(f"mismatch vs reference: max abs diff = {max_err}")

    print("KERNEL_OK")
</pallas_src>

<mosaic_0001>
module attributes {stable_mosaic.version = 11 : i64} {
  func.func @_conv_stats_kernel(%arg0: i32, %arg1: memref<256x36xbf16, #tpu.memory_space<vmem>>, %arg2: memref<36x128xbf16, #tpu.memory_space<vmem>>, %arg3: memref<1x2x128xf32, #tpu.memory_space<vmem>>) attributes {dimension_semantics = [#tpu.dimension_semantics<parallel>], iteration_bounds = array<i64: 2>, scalar_prefetch = 0 : i64, scratch_operands = 0 : i64, tpu.core_type = #tpu.core_type<tc>, window_params = [{transform_indices = @transform_0, window_bounds = array<i64: 256, 36>}, {pipeline_mode = #tpu.pipeline_mode<synchronous>, transform_indices = @transform_1, window_bounds = array<i64: 36, 128>}, {transform_indices = @transform_2, window_bounds = array<i64: 1, 2, 128>}]} {
    %c0 = arith.constant 0 : index
    %c0_0 = arith.constant 0 : index
    %0 = vector.load %arg1[%c0, %c0_0] : memref<256x36xbf16, #tpu.memory_space<vmem>>, vector<256x36xbf16>
    %c0_1 = arith.constant 0 : index
    %c0_2 = arith.constant 0 : index
    %1 = vector.load %arg2[%c0_1, %c0_2] : memref<36x128xbf16, #tpu.memory_space<vmem>>, vector<36x128xbf16>
    %cst = arith.constant dense<0.000000e+00> : vector<256x128xf32>
    %2 = tpu.matmul %0, %1, %cst {dimension_numbers = #tpu.dot_dimension_numbers<[1], [0], [0], [1], [0, 0, 1, 1], [], []>} : vector<256x36xbf16>, vector<36x128xbf16>, vector<256x128xf32> -> vector<256x128xf32>
    %cst_3 = arith.constant dense<0.000000e+00> : vector<128xf32>
    %3 = vector.multi_reduction <add>, %2, %cst_3 [0] : vector<256x128xf32> to vector<128xf32>
    %4 = vector.shape_cast %3 : vector<128xf32> to vector<1x128xf32>
    %5 = arith.mulf %2, %2 : vector<256x128xf32>
    %cst_4 = arith.constant dense<0.000000e+00> : vector<128xf32>
    %6 = vector.multi_reduction <add>, %5, %cst_4 [0] : vector<256x128xf32> to vector<128xf32>
    %7 = vector.shape_cast %6 : vector<128xf32> to vector<1x128xf32>
    %8 = tpu.concatenate %4, %7 in 0 : vector<1x128xf32>, vector<1x128xf32> -> vector<2x128xf32>
    %9 = vector.shape_cast %8 : vector<2x128xf32> to vector<1x2x128xf32>
    %c0_5 = arith.constant 0 : index
    %c0_6 = arith.constant 0 : index
    %c0_7 = arith.constant 0 : index
    %10 = vector.load %arg3[%c0_5, %c0_6, %c0_7] : memref<1x2x128xf32, #tpu.memory_space<vmem>>, vector<1x2x128xf32>
    tpu.vector_store %arg3[%c0_5, %c0_6, %c0_7], %9 {strides = array<i32>} : memref<1x2x128xf32, #tpu.memory_space<vmem>>, vector<1x2x128xf32>,
    return
  }
  func.func @transform_0(%arg0: i32) -> (i32, i32) {
    %c0_i32 = arith.constant 0 : i32
    %c0_i32_0 = arith.constant 0 : i32
    return %arg0, %c0_i32 : i32, i32
  }
  func.func @transform_1(%arg0: i32) -> (i32, i32) {
    %c0_i32 = arith.constant 0 : i32
    %c0_i32_0 = arith.constant 0 : i32
    %c0_i32_1 = arith.constant 0 : i32
    return %c0_i32, %c0_i32_0 : i32, i32
  }
  func.func @transform_2(%arg0: i32) -> (i32, i32, i32) {
    %c0_i32 = arith.constant 0 : i32
    %c0_i32_0 = arith.constant 0 : i32
    %c0_i32_1 = arith.constant 0 : i32
    return %arg0, %c0_i32, %c0_i32_0 : i32, i32, i32
  }
}

module attributes {stable_mosaic.version = 11 : i64} {
  func.func @_conv_bn_silu_pool_kernel(%arg0: i32, %arg1: memref<256x36xbf16, #tpu.memory_space<vmem>>, %arg2: memref<36x128xbf16, #tpu.memory_space<vmem>>, %arg3: memref<1x128xf32, #tpu.memory_space<vmem>>, %arg4: memref<1x128xf32, #tpu.memory_space<vmem>>, %arg5: memref<8x8x128xf32, #tpu.memory_space<vmem>>) attributes {dimension_semantics = [#tpu.dimension_semantics<parallel>], iteration_bounds = array<i64: 2>, scalar_prefetch = 0 : i64, scratch_operands = 0 : i64, tpu.core_type = #tpu.core_type<tc>, window_params = [{transform_indices = @transform_0, window_bounds = array<i64: 256, 36>}, {pipeline_mode = #tpu.pipeline_mode<synchronous>, transform_indices = @transform_1, window_bounds = array<i64: 36, 128>}, {pipeline_mode = #tpu.pipeline_mode<synchronous>, transform_indices = @transform_2, window_bounds = array<i64: 1, 128>}, {pipeline_mode = #tpu.pipeline_mode<synchronous>, transform_indices = @transform_3, window_bounds = array<i64: 1, 128>}, {transform_indices = @transform_4, window_bounds = array<i64: 8, 8, 128>}]} {
    %c0 = arith.constant 0 : index
    %c0_0 = arith.constant 0 : index
    %0 = vector.load %arg1[%c0, %c0_0] : memref<256x36xbf16, #tpu.memory_space<vmem>>, vector<256x36xbf16>
    %c0_1 = arith.constant 0 : index
    %c0_2 = arith.constant 0 : index
    %1 = vector.load %arg2[%c0_1, %c0_2] : memref<36x128xbf16, #tpu.memory_space<vmem>>, vector<36x128xbf16>
    %cst = arith.constant dense<0.000000e+00> : vector<256x128xf32>
    %2 = tpu.matmul %0, %1, %cst {dimension_numbers = #tpu.dot_dimension_numbers<[1], [0], [0], [1], [0, 0, 1, 1], [], []>} : vector<256x36xbf16>, vector<36x128xbf16>, vector<256x128xf32> -> vector<256x128xf32>
    %c0_3 = arith.constant 0 : index
    %c0_4 = arith.constant 0 : index
    %3 = vector.load %arg3[%c0_3, %c0_4] : memref<1x128xf32, #tpu.memory_space<vmem>>, vector<1x128xf32>
    %4 = vector.broadcast %3 : vector<1x128xf32> to vector<256x128xf32>
    %5 = arith.mulf %2, %4 : vector<256x128xf32>
    %c0_5 = arith.constant 0 : index
    %c0_6 = arith.constant 0 : index
    %6 = vector.load %arg4[%c0_5, %c0_6] : memref<1x128xf32, #tpu.memory_space<vmem>>, vector<1x128xf32>
    %7 = vector.broadcast %6 : vector<1x128xf32> to vector<256x128xf32>
    %8 = arith.addf %5, %7 : vector<256x128xf32>
    %9 = arith.negf %8 : vector<256x128xf32>
    %10 = math.exp %9 : vector<256x128xf32>
    %cst_7 = arith.constant 1.000000e+00 : f32
    %11 = vector.broadcast %cst_7 : f32 to vector<256x128xf32>
    %12 = arith.addf %11, %10 : vector<256x128xf32>
    %13 = arith.divf %11, %12 : vector<256x128xf32>
    %14 = arith.mulf %8, %13 : vector<256x128xf32>
    %15 = vector.shape_cast %14 : vector<256x128xf32> to vector<128x2x128xf32>
    %cst_8 = arith.constant dense<0xFF800000> : vector<128x128xf32>
    %16 = vector.multi_reduction <maximumf>, %15, %cst_8 [1] : vector<128x2x128xf32> to vector<128x128xf32>
    %17 = vector.shape_cast %16 : vector<128x128xf32> to vector<8x2x8x128xf32>
    %18 = vector.extract_strided_slice %17 {offsets = [0, 0, 0, 0], sizes = [8, 1, 8, 128], strides = [1, 1, 1, 1]} : vector<8x2x8x128xf32> to vector<8x1x8x128xf32>
    %19 = vector.shape_cast %18 : vector<8x1x8x128xf32> to vector<8x8x128xf32>
    %20 = vector.extract_strided_slice %17 {offsets = [0, 1, 0, 0], sizes = [8, 1, 8, 128], strides = [1, 1, 1, 1]} : vector<8x2x8x128xf32> to vector<8x1x8x128xf32>
    %21 = vector.shape_cast %20 : vector<8x1x8x128xf32> to vector<8x8x128xf32>
    %22 = arith.maximumf %19, %21 : vector<8x8x128xf32>
    %c0_9 = arith.constant 0 : index
    %c0_10 = arith.constant 0 : index
    %c0_11 = arith.constant 0 : index
    %23 = vector.load %arg5[%c0_9, %c0_10, %c0_11] : memref<8x8x128xf32, #tpu.memory_space<vmem>>, vector<8x8x128xf32>
    tpu.vector_store %arg5[%c0_9, %c0_10, %c0_11], %22 {strides = array<i32>} : memref<8x8x128xf32, #tpu.memory_space<vmem>>, vector<8x8x128xf32>,
    return
  }
  func.func @transform_0(%arg0: i32) -> (i32, i32) {
    %c0_i32 = arith.constant 0 : i32
    %c0_i32_0 = arith.constant 0 : i32
    return %arg0, %c0_i32 : i32, i32
  }
  func.func @transform_1(%arg0: i32) -> (i32, i32) {
    %c0_i32 = arith.constant 0 : i32
    %c0_i32_0 = arith.constant 0 : i32
    %c0_i32_1 = arith.constant 0 : i32
    return %c0_i32, %c0_i32_0 : i32, i32
  }
  func.func @transform_2(%arg0: i32) -> (i32, i32) {
    %c0_i32 = arith.constant 0 : i32
    %c0_i32_0 = arith.constant 0 : i32
    %c0_i32_1 = arith.constant 0 : i32
    return %c0_i32, %c0_i32_0 : i32, i32
  }
  func.func @transform_3(%arg0: i32) -> (i32, i32) {
    %c0_i32 = arith.constant 0 : i32
    %c0_i32_0 = arith.constant 0 : i32
    %c0_i32_1 = arith.constant 0 : i32
    return %c0_i32, %c0_i32_0 : i32, i32
  }
  func.func @transform_4(%arg0: i32) -> (i32, i32, i32) {
    %c0_i32 = arith.constant 0 : i32
    %c0_i32_0 = arith.constant 0 : i32
    %c0_i32_1 = arith.constant 0 : i32
    return %arg0, %c0_i32, %c0_i32_0 : i32, i32, i32
  }
}

</mosaic_0001>

<bundles_post_ra>
// kernel: conv_block.2
= control target key start
LH: loop header
LB: loop body
LE: loop exit
PB: predicated region body
PF: predicated region fallthrough
CT: control target
= control target key end

     0   :  { %s813_s9 = smov 0   ;;  %s908_s0 = inlined_call_operand.vmem [shape: bf16[512,36], index: 0, kind: input, shape index: {}]   ;;  %s909_s1 = inlined_call_operand.vmem [shape: bf16[36,128], index: 1, kind: input, shape index: {}]   ;;  %s910_s2 = inlined_call_operand.vmem [shape: f32[2,2,128], index: 2, kind: output, shape index: {}]  }
   0x1 LB: > { %s819_s10 = sadd.s32 4294967295, %s796_s9   ;;  %p657_p0 = scmp.ge.s32.totalorder %s796_s9, 1  ;;  %s796_s9 = sphi %s813_s9, %s12_s9  }
   0x2   : > { %p113_p1 = scmp.lt.s32.totalorder %s796_s9, 3 }
   0x4   : > { %p114_p2 = pnand %p657_p0, %p113_p1 }
   0x5   : > { %v771_v0 = vld [vmem:[%s909_s1] sm:$0xff] (!%p114_p2)   ;;  %v772_v1 = vld [vmem:[%s909_s1 + $0x8] sm:$0xff] (!%p114_p2)   ;;  %s658_s15 = sshll.u32 (!%p114_p2), %s819_s10, 5  ;;  %v773_v2 = vld [vmem:[%s909_s1 + $0x10] ss:$0 sps:$4 sm:$0x33] (!%p114_p2)  }
   0x6   : > { %117 = sbr.rel (%p114_p2) target bundleno = 311 (0x137), region = 28  ;;  %717 = vmatprep.subr.bf16.mxu0 (!%p114_p2), %v771_v0  ;;  %p135_p3 = scmp.lt.s32.totalorder (!%p114_p2), %s658_s15, 63  ;;  %755 = vmatprep.subr.bf16.mxu1 (!%p114_p2), %v771_v0  ;;  %vm326_vm0 = vcmask (!%p114_p2), 1041408   ;;  %vm277_vm1 = vcmask (!%p114_p2), 293888   ;;  %vm597_vm2 = vcmask (!%p114_p2), 1040384  }
   0x7   : > { %718 = vmatpush3.bf16.msra.mxu0 (!%p114_p2), %v771_v0  ;;  %758 = vmatpush3.bf16.msra.mxu1 (!%p114_p2), %v771_v0  ;;  %v328_v3 = vsel (!%p114_p2), %vm326_vm0, %v773_v2, 0  ;;  %p140_p4 = scmp.lt.s32.totalorder (!%p114_p2), %s819_s10, 1 }
   0x8   : > { %719 = vmatprep.subr.bf16.mxu0 (!%p114_p2), %v772_v1  ;;  %756 = vmatprep.subr.bf16.mxu1 (!%p114_p2), %v772_v1 }
   0xb   : > { %720 = vmatpush3.bf16.msra.mxu0 (!%p114_p2), %v772_v1  ;;  %759 = vmatpush3.bf16.msra.mxu1 (!%p114_p2), %v772_v1 }
   0xc   : > { %761 = vmatprep.subr.msk.bf16.mxu0 (!%p114_p2), %vm326_vm0, %v773_v2  ;;  %762 = vmatprep.subr.msk.bf16.mxu1 (!%p114_p2), %vm326_vm0, %v773_v2 }
   0xd   : > { %s912_s15 = smov (!%p135_p3, %s658_s15), 63  ;;  %s914_s10 = smov (!%p140_p4, %s819_s10), 1 }
   0xe   : > { %s659_s18 = sshll.u32 %s912_s15, 2  ;;  %s660_s22 = sshll.u32 %s914_s10, 1 }
   0xf   : > { %s836_s21 = scalar_lea.vmem %s908_s0, %s659_s18  ;;  %722 = vmatpush3.bf16.msra.mxu0 %v328_v3  ;;  %760 = vmatpush3.bf16.msra.mxu1 %v328_v3  ;;  %s143_s25 = scalar_lea.vmem %s910_s2, %s660_s22 }
  0x10   : > { %v774_v4 = vld [vmem:[%s836_s21] sm:$0xff]   ;;  %v775_v5 = vld [vmem:[%s836_s21 + $0x8] sm:$0xff]   ;;  %v776_v6 = vld [vmem:[%s836_s21 + $0x10] sm:$0xff]  }
  0x11   : > { %723 = vmatprep.mubr.msk.bf16.mxu0 %vm277_vm1, %v774_v4  ;;  %v777_v7 = vld [vmem:[%s836_s21 + $0x18] sm:$0xff]   ;;  %v782_v8 = vld [vmem:[%s836_s21 + $0x40] sm:$0xff]   ;;  %v783_v9 = vld [vmem:[%s836_s21 + $0x48] sm:$0xff]  }
  0x12   : > { %724 = vmatmul.mubr.msk.bf16.vlgmr.msra.gmra.mrb[0].mxu0 %vm277_vm1, %v775_v5  ;;  %739 = vmatprep.mubr.msk.bf16.mxu1 %vm277_vm1, %v782_v8  ;;  %v784_v10 = vld [vmem:[%s836_s21 + $0x50] sm:$0xff]   ;;  %v778_v11 = vld [vmem:[%s836_s21 + $0x20] sm:$0xff]   ;;  %v785_v12 = vld [vmem:[%s836_s21 + $0x58] sm:$0xff]  }
  0x13   : > { %727 = vmatprep.mubr.msk.bf16.mxu0 %vm277_vm1, %v776_v6  ;;  %740 = vmatmul.mubr.msk.bf16.vlgmr.msra.gmra.mrb[0].mxu1 %vm277_vm1, %v783_v9  ;;  %v786_v13 = vld [vmem:[%s836_s21 + $0x60] sm:$0xff]   ;;  %v779_v14 = vld [vmem:[%s836_s21 + $0x28] sm:$0xff]   ;;  %v780_v15 = vld [vmem:[%s836_s21 + $0x30] sm:$0xff]  }
  0x14   : > { %743 = vmatprep.mubr.msk.bf16.mxu1 %vm277_vm1, %v784_v10  ;;  %v787_v16 = vld [vmem:[%s836_s21 + $0x68] sm:$0xff]   ;;  %v788_v17 = vld [vmem:[%s836_s21 + $0x70] sm:$0xff]   ;;  %v781_v18 = vld [vmem:[%s836_s21 + $0x38] sm:$0xff]  }
  0x15   : > { %v789_v19 = vld [vmem:[%s836_s21 + $0x78] sm:$0xff]  }
  0x1a   : > { %728 = vmatmul.mubr.msk.bf16.gmra.mrb[4].mxu0 %vm277_vm1, %v777_v7 }
  0x1b   : > { %731 = vmatprep.mubr.msk.bf16.mxu0 %vm277_vm1, %v778_v11  ;;  %744 = vmatmul.mubr.msk.bf16.gmra.mrb[4].mxu1 %vm277_vm1, %v785_v12 }
  0x1c   : > { %747 = vmatprep.mubr.msk.bf16.mxu1 %vm277_vm1, %v786_v13 }
  0x22   : > { %732 = vmatmul.mubr.msk.bf16.gmra.mrb[8].mxu0 %vm277_vm1, %v779_v14 }
  0x23   : > { %735 = vmatprep.mubr.msk.bf16.mxu0 %vm277_vm1, %v780_v15  ;;  %748 = vmatmul.mubr.msk.bf16.gmra.mrb[8].mxu1 %vm277_vm1, %v787_v16 }
  0x24   : > { %751 = vmatprep.mubr.msk.bf16.mxu1 %vm277_vm1, %v788_v17 }
  0x2a   : > { %736 = vmatmul.mubr.msk.bf16.gmra.mrb[12].mxu0 %vm277_vm1, %v781_v18 }
  0x2b   : > { %752 = vmatmul.mubr.msk.bf16.gmra.mrb[12].mxu1 %vm277_vm1, %v789_v19 }
  0xe5   : > { %v725_v20 = vpop.f32.mrb[0].mxu0 }
  0xe6   : > { %v364_v21 = vpop.f32.mrb[1].mxu0  ;;  %v870_v27 = vpop.f32.mrb[0].mxu1  ;;  %v530_v28 = vmul.f32 %v725_v20, %v725_v20 }
  0xe7   : > { %v726_v22 = vpop.f32.mrb[2].mxu0  ;;  %v528_v24 = vmul.f32 %v364_v21, %v364_v21  ;;  %v872_v31 = vpop.f32.mrb[1].mxu1 }
  0xe8   : > { %v367_v23 = vpop.f32.mrb[3].mxu0  ;;  %v874_v32 = vpop.f32.mrb[2].mxu1  ;;  %v531_v33 = vmul.f32 %v726_v22, %v726_v22 }
  0xe9   : > { %v491_v25 = vadd.f32 %v367_v23, %v364_v21  ;;  %v529_v26 = vmul.f32 %v367_v23, %v367_v23  ;;  %v876_v37 = vpop.f32.mrb[3].mxu1 }
  0xeb   : > { %v492_v29 = vadd.f32 %v725_v20, %v491_v25  ;;  %v560_v30 = vadd.f32 %v529_v26, %v528_v24 }
  0xed   : > { %v561_v34 = vadd.f32 %v560_v30, %v530_v28  ;;  %v729_v35 = vpop.f32.mrb[4].mxu0  ;;  %v493_v36 = vadd.f32 %v726_v22, %v492_v29 }
  0xee   : > { %v380_v38 = vpop.f32.mrb[5].mxu0  ;;  %v878_v47 = vpop.f32.mrb[4].mxu1  ;;  %v534_v48 = vmul.f32 %v729_v35, %v729_v35 }
  0xef   : > { %v494_v39 = vadd.f32 %v493_v36, %v380_v38  ;;  %v532_v40 = vmul.f32 %v380_v38, %v380_v38  ;;  %v562_v41 = vadd.f32 %v561_v34, %v531_v33  ;;  %v730_v42 = vpop.f32.mrb[6].mxu0  ;;  %v444_v51 = vpop.f32.mrb[5].mxu1 }
  0xf0   : > { %v383_v43 = vpop.f32.mrb[7].mxu0  ;;  %v880_v52 = vpop.f32.mrb[6].mxu1  ;;  %v535_v53 = vmul.f32 %v730_v42, %v730_v42 }
  0xf1   : > { %v563_v44 = vadd.f32 %v562_v41, %v532_v40  ;;  %v495_v45 = vadd.f32 %v494_v39, %v383_v43  ;;  %v533_v46 = vmul.f32 %v383_v43, %v383_v43  ;;  %v447_v57 = vpop.f32.mrb[7].mxu1  ;;  %v546_v43 = vmul.f32 %v870_v27, %v870_v27 }
  0xf3   : > { %v496_v49 = vadd.f32 %v729_v35, %v495_v45  ;;  %v564_v50 = vadd.f32 %v563_v44, %v533_v46  ;;  %v544_v35 = vmul.f32 %v872_v31, %v872_v31  ;;  %v547_v46 = vmul.f32 %v874_v32, %v874_v32 }
  0xf5   : > { %v565_v54 = vadd.f32 %v564_v50, %v534_v48  ;;  %v733_v55 = vpop.f32.mrb[8].mxu0  ;;  %v497_v56 = vadd.f32 %v730_v42, %v496_v49  ;;  %v545_v42 = vmul.f32 %v876_v37, %v876_v37 }
  0xf6   : > { %v396_v58 = vpop.f32.mrb[9].mxu0  ;;  %v749_v3 = vpop.f32.mrb[8].mxu1  ;;  %v538_v4 = vmul.f32 %v733_v55, %v733_v55 }
  0xf7   : > { %v498_v59 = vadd.f32 %v497_v56, %v396_v58  ;;  %v536_v60 = vmul.f32 %v396_v58, %v396_v58  ;;  %v566_v61 = vadd.f32 %v565_v54, %v535_v53  ;;  %v734_v62 = vpop.f32.mrb[10].mxu0  ;;  %v460_v7 = vpop.f32.mrb[9].mxu1  ;;  %v549_v56 = vmul.f32 %v447_v57, %v447_v57 }
  0xf8   : > { %v399_v63 = vpop.f32.mrb[11].mxu0  ;;  %v750_v8 = vpop.f32.mrb[10].mxu1  ;;  %v539_v9 = vmul.f32 %v734_v62, %v734_v62 }
  0xf9   : > { %v567_v0 = vadd.f32 %v566_v61, %v536_v60  ;;  %v499_v1 = vadd.f32 %v498_v59, %v399_v63  ;;  %v537_v2 = vmul.f32 %v399_v63, %v399_v63  ;;  %v463_v13 = vpop.f32.mrb[11].mxu1 }
  0xfb   : > { %v500_v5 = vadd.f32 %v733_v55, %v499_v1  ;;  %v568_v6 = vadd.f32 %v567_v0, %v537_v2  ;;  %v553_v1 = vmul.f32 %v463_v13, %v463_v13  ;;  %v554_v2 = vmul.f32 %v749_v3, %v749_v3 }
  0xfd   : > { %v569_v10 = vadd.f32 %v568_v6, %v538_v4  ;;  %v737_v11 = vpop.f32.mrb[12].mxu0  ;;  %v501_v12 = vadd.f32 %v734_v62, %v500_v5  ;;  %v552_v62 = vmul.f32 %v460_v7, %v460_v7  ;;  %v555_v5 = vmul.f32 %v750_v8, %v750_v8 }
  0xfe   : > { %v412_v14 = vpop.f32.mrb[13].mxu0  ;;  %v753_v23 = vpop.f32.mrb[12].mxu1  ;;  %v542_v24 = vmul.f32 %v737_v11, %v737_v11 }
  0xff   : > { %v502_v15 = vadd.f32 %v501_v12, %v412_v14  ;;  %v540_v16 = vmul.f32 %v412_v14, %v412_v14  ;;  %v570_v17 = vadd.f32 %v569_v10, %v539_v9  ;;  %v738_v18 = vpop.f32.mrb[14].mxu0  ;;  %v476_v28 = vpop.f32.mrb[13].mxu1 }
 0x100   : > { %v415_v19 = vpop.f32.mrb[15].mxu0  ;;  %v754_v29 = vpop.f32.mrb[14].mxu1  ;;  %v543_v30 = vmul.f32 %v738_v18, %v738_v18  ;;  %v556_v9 = vmul.f32 %v476_v28, %v476_v28 }
 0x101   : > { %v571_v20 = vadd.f32 %v570_v17, %v540_v16  ;;  %v503_v21 = vadd.f32 %v502_v15, %v415_v19  ;;  %v541_v22 = vmul.f32 %v415_v19, %v415_v19  ;;  %v479_v36 = vpop.f32.mrb[15].mxu1  ;;  %v558_v15 = vmul.f32 %v753_v23, %v753_v23 }
 0x102   : > { %v559_v17 = vmul.f32 %v754_v29, %v754_v29 }
 0x103   : > { %v504_v25 = vadd.f32 %v737_v11, %v503_v21  ;;  %v572_v26 = vadd.f32 %v571_v20, %v541_v22 }
 0x105   : > { %v573_v33 = vadd.f32 %v572_v26, %v542_v24  ;;  %v505_v34 = vadd.f32 %v738_v18, %v504_v25 }
 0x107   : > { %v506_v38 = vadd.f32 %v505_v34, %v872_v31  ;;  %v574_v39 = vadd.f32 %v573_v33, %v543_v30  ;;  %v548_v31 = vmul.f32 %v444_v51, %v444_v51 }
 0x109   : > { %v575_v40 = vadd.f32 %v574_v39, %v544_v35  ;;  %v507_v41 = vadd.f32 %v506_v38, %v876_v37  ;;  %v550_v37 = vmul.f32 %v878_v47, %v878_v47 }
 0x10b   : > { %v508_v44 = vadd.f32 %v870_v27, %v507_v41  ;;  %v576_v45 = vadd.f32 %v575_v40, %v545_v42  ;;  %v551_v27 = vmul.f32 %v880_v52, %v880_v52 }
 0x10d   : > { %v577_v48 = vadd.f32 %v576_v45, %v546_v43  ;;  %v509_v49 = vadd.f32 %v874_v32, %v508_v44 }
 0x10f   : > { %v510_v50 = vadd.f32 %v509_v49, %v444_v51  ;;  %v578_v53 = vadd.f32 %v577_v48, %v547_v46 }
 0x111   : > { %v579_v54 = vadd.f32 %v578_v53, %v548_v31  ;;  %v511_v55 = vadd.f32 %v510_v50, %v447_v57 }
 0x113   : > { %v512_v58 = vadd.f32 %v878_v47, %v511_v55  ;;  %v580_v59 = vadd.f32 %v579_v54, %v549_v56 }
 0x115   : > { %v581_v60 = vadd.f32 %v580_v59, %v550_v37  ;;  %v513_v61 = vadd.f32 %v880_v52, %v512_v58  ;;  %v557_v52 = vmul.f32 %v479_v36, %v479_v36 }
 0x117   : > { %v514_v32 = vadd.f32 %v513_v61, %v460_v7  ;;  %v582_v63 = vadd.f32 %v581_v60, %v551_v27 }
 0x119   : > { %v583_v51 = vadd.f32 %v582_v63, %v552_v62  ;;  %v515_v0 = vadd.f32 %v514_v32, %v463_v13 }
 0x11b   : > { %v516_v57 = vadd.f32 %v749_v3, %v515_v0  ;;  %v584_v4 = vadd.f32 %v583_v51, %v553_v1 }
 0x11d   : > { %v585_v6 = vadd.f32 %v584_v4, %v554_v2  ;;  %v517_v47 = vadd.f32 %v750_v8, %v516_v57 }
 0x11f   : > { %v518_v10 = vadd.f32 %v517_v47, %v476_v28  ;;  %v586_v11 = vadd.f32 %v585_v6, %v555_v5 }
 0x121   : > { %v587_v12 = vadd.f32 %v586_v11, %v556_v9  ;;  %v519_v14 = vadd.f32 %v518_v10, %v479_v36 }
 0x123   : > { %v520_v7 = vadd.f32 %v753_v23, %v519_v14  ;;  %v588_v16 = vadd.f32 %v587_v12, %v557_v52 }
 0x125   : > { %v521_v18 = vadd.f32 %v754_v29, %v520_v7  ;;  %v589_v13 = vadd.f32 %v588_v16, %v558_v15 }
 0x127   : > { %v522_v19 = vrot.slane %v521_v18, 4  ;;  %v590_v3 = vadd.f32 %v589_v13, %v559_v17 }
 0x129   : > { %v523_v20 = vadd.f32 %v522_v19, %v521_v18  ;;  %v591_v21 = vrot.slane %v590_v3, 4 }
 0x12b   : > { %v524_v22 = vrot.slane %v523_v20, 2  ;;  %v592_v8 = vadd.f32 %v591_v21, %v590_v3 }
 0x12d   : > { %v525_v24 = vadd.f32 %v524_v22, %v523_v20  ;;  %v593_v25 = vrot.slane %v592_v8, 2 }
 0x12f   : > { %v526_v26 = vrot.slane %v525_v24, 1  ;;  %v594_v28 = vadd.f32 %v593_v25, %v592_v8 }
 0x131   : > { %v595_v30 = vrot.slane %v594_v28, 1  ;;  %v527_v23 = vadd.f32 %v526_v26, %v525_v24 }
 0x133   : > { %v596_v29 = vadd.f32 %v595_v30, %v594_v28 }
 0x135   : > { %v598_v33 = vsel %vm597_vm2, %v527_v23, %v596_v29 }
 0x136   : > { %599 = vst [vmem:[%s143_s25] sm:$0x3] %v598_v33 }
 0x137 PF: > { %s12_s9 = sadd.s32 1, %s796_s9  }
 0x138   : > { %p9_p5 = scmp.ge.s32.totalorder %s12_s9, 4  }
 0x13a   :  { %11 = sbr.rel (!%p9_p5) target bundleno = 1 (0x1), region = 58 }

// kernel: conv_block.3
= control target key start
LH: loop header
LB: loop body
LE: loop exit
PB: predicated region body
PF: predicated region fallthrough
CT: control target
= control target key end

     0   :  { %9 = vsyncpa [#allocation3], 0  ;;  %s4164_s0 = inlined_call_operand.vmem [shape: bf16[512,36], index: 0, kind: input, shape index: {}]   ;;  %s4165_s1 = inlined_call_operand.vmem [shape: bf16[36,128], index: 1, kind: input, shape index: {}]   ;;  %s4166_s2 = inlined_call_operand.vmem [shape: f32[1,128], index: 2, kind: input, shape index: {}]   ;;  %s4167_s3 = inlined_call_operand.vmem [shape: f32[1,128], index: 3, kind: input, shape index: {}]   ;;  %s4168_s4 = inlined_call_operand.hbm [shape: f32[16,8,128], index: 4, kind: output, shape index: {}]  }
   0x1   :  { %11 = vsyncpa [#allocation3 + $0x1], 0  ;;  %s3164_s15 = smov 0   ;;  %s3166_s16 = smov 0  }
   0x2   :  { %s3168_s17 = smov 0   ;;  %s3170_s18 = smov 0  }
   0x3 LB: > { %s3185_s19 = sadd.s32 4294967295, %s3133_s18   ;;  %s2731_s20 = sadd.s32 4294967294, %s3133_s18   ;;  %s3133_s18 = sphi %s3170_s18, %s4186_s18   ;;  %s3129_s17 = sphi %s3168_s17, %s4185_s17   ;;  %s3125_s16 = sphi %s3166_s16, %s4184_s16   ;;  %s3121_s15 = sphi %s3164_s15, %s4183_s15  }
   0x4   : > { %s3189_s21 = sadd.s32 1, %s3133_s18   ;;  %s113_s22 = sadd.s32 1, %s3129_s17 }
   0x5   : > { %s110_s23 = ssub.s32 %s3133_s18, %s3189_s21  ;;  %p123_p0 = scmp.ne.s32.totalorder %s3129_s17, %s3125_s16 }
   0x6   : > { %p111_p1 = scmp.eq.s32.totalorder %s110_s23, 0  ;;  %p124_p2 = scmp.eq.s32.totalorder %s3185_s19, 1 }
   0x7   : > { %p129_p3 = scmp.ne.s32.totalorder %s3125_s16, %s3121_s15  ;;  %p130_p4 = scmp.eq.s32.totalorder %s2731_s20, 1 }
   0x8   : > { %s3200_s24 = scalar_select %p111_p1, %s3129_s17, %s113_s22  }
   0x9   : > { %p3202_p5 = por %p124_p2, %p123_p0  ;;  %p3206_p6 = por %p130_p4, %p129_p3 }
   0xa   : > { %p2734_p7 = scmp.ge.s32.totalorder %s3133_s18, 1  ;;  %p166_p8 = scmp.lt.s32.totalorder %s3133_s18, 3 }
   0xc   : > { %p167_p9 = pnand %p2734_p7, %p166_p8 }
   0xe   : > { %170 = sbr.rel (%p167_p9) target bundleno = 632 (0x278), region = 36 }
  0x15   : > { %v2920_v0 = vld [vmem:[%s4165_s1] sm:$0xff]   ;;  %v2921_v1 = vld [vmem:[%s4165_s1 + $0x8] sm:$0xff]   ;;  %s2736_s5 = sshll.u32 %s3185_s19, 5  ;;  %v2922_v2 = vld [vmem:[%s4165_s1 + $0x10] ss:$0 sps:$4 sm:$0x33]  }
  0x16   : > { %2832 = vmatprep.subr.bf16.mxu0 %v2920_v0  ;;  %2870 = vmatprep.subr.bf16.mxu1 %v2920_v0  ;;  %p193_p10 = scmp.lt.s32.totalorder %s2736_s5, 63  ;;  %vm381_vm0 = vcmask 1041408   ;;  %vm332_vm1 = vcmask 293888   ;;  %v3265_v20 = vld [vmem:[%s4166_s2] ss:$0 sm:$0xff]  ;;  %vm2576_vm2 = vcmask 1041409  }
  0x17   : > { %2833 = vmatpush3.bf16.msra.mxu0 %v2920_v0  ;;  %2873 = vmatpush3.bf16.msra.mxu1 %v2920_v0  ;;  %v383_v3 = vsel %vm381_vm0, %v2922_v2, 0  ;;  %v3270_v22 = vld [vmem:[%s4167_s3] ss:$0 sm:$0xff]  ;;  %vm2578_vm3 = vcmask 1042434   ;;  %vm2580_vm4 = vcmask 1043459   ;;  %vm2582_vm5 = vcmask 1044484  }
  0x18   : > { %2834 = vmatprep.subr.bf16.mxu0 %v2921_v1  ;;  %2871 = vmatprep.subr.bf16.mxu1 %v2921_v1  ;;  %s4188_s5 = smov (!%p193_p10, %s2736_s5), 63  ;;  %vm2584_vm6 = vcmask 1045509   ;;  %vm2586_vm7 = vcmask 1046534   ;;  %vm2588_vm8 = vcmask 1047559   ;;  %s189_s22 = sand.u32 1, %s3125_s16  }
  0x19   : > { %s2737_s8 = sshll.u32 %s4188_s5, 2  ;;  %s2735_s23 = sshll.u32 %s189_s22, 6 }
  0x1a   : > { %s3225_s11 = scalar_lea.vmem %s4164_s0, %s2737_s8  ;;  %s3559_s27 = scalar_lea.vmem [#allocation2], %s2735_s23 }
  0x1b   : > { %2835 = vmatpush3.bf16.msra.mxu0 %v2921_v1  ;;  %2874 = vmatpush3.bf16.msra.mxu1 %v2921_v1  ;;  %v2923_v4 = vld [vmem:[%s3225_s11] sm:$0xff]   ;;  %v2925_v6 = vld [vmem:[%s3225_s11 + $0x8] sm:$0xff]   ;;  %v2927_v8 = vld [vmem:[%s3225_s11 + $0x10] sm:$0xff]   ;;  %s2812_s10 = sshll.u32 %s3185_s19, 10  ;;  %s4123_s19 = scalar_lea.sflag [#allocation3], %s189_s22 }
  0x1c   : > { %2876 = vmatprep.subr.msk.bf16.mxu0 %vm381_vm0, %v2922_v2  ;;  %2877 = vmatprep.subr.msk.bf16.mxu1 %vm381_vm0, %v2922_v2  ;;  %v2924_v5 = vld [vmem:[%s3225_s11 + $0x40] sm:$0xff]   ;;  %v2926_v7 = vld [vmem:[%s3225_s11 + $0x48] sm:$0xff]   ;;  %v2928_v9 = vld [vmem:[%s3225_s11 + $0x50] sm:$0xff]   ;;  %s4114_s14 = scalar_lea.hbm %s4168_s4, %s2812_s10  ;;  %s3136_s23 = smov [#allocation2]  }
  0x1d   : > { %2838 = vmatprep.mubr.msk.bf16.mxu0 %vm332_vm1, %v2923_v4  ;;  %2854 = vmatprep.mubr.msk.bf16.mxu1 %vm332_vm1, %v2924_v5  ;;  %v2929_v10 = vld [vmem:[%s3225_s11 + $0x18] sm:$0xff]   ;;  %v2931_v12 = vld [vmem:[%s3225_s11 + $0x20] sm:$0xff]   ;;  %v2933_v14 = vld [vmem:[%s3225_s11 + $0x28] sm:$0xff]   ;;  %s3075_s28 = sshll.u32 %s3136_s23, 4  ;;  %s3076_s28 = int_to_ptr.vmem [resolvable:$false] %s3075_s28 }
  0x1e   : > { %v2930_v11 = vld [vmem:[%s3225_s11 + $0x58] sm:$0xff]   ;;  %v2932_v13 = vld [vmem:[%s3225_s11 + $0x60] sm:$0xff]   ;;  %v2934_v15 = vld [vmem:[%s3225_s11 + $0x68] sm:$0xff]   ;;  %s3077_s29 = scalar_lea.vmem %s3076_s28, 2048 }
  0x1f   : > { %2837 = vmatpush3.bf16.msra.mxu0 %v383_v3  ;;  %2875 = vmatpush3.bf16.msra.mxu1 %v383_v3  ;;  %v2935_v16 = vld [vmem:[%s3225_s11 + $0x30] sm:$0xff]   ;;  %v2937_v18 = vld [vmem:[%s3225_s11 + $0x38] sm:$0xff]  }
  0x20   : > { %v2936_v17 = vld [vmem:[%s3225_s11 + $0x70] sm:$0xff]   ;;  %v2938_v19 = vld [vmem:[%s3225_s11 + $0x78] sm:$0xff]   ;;  %s2669_s11 = sshll.u32 %s3559_s27, 4  ;;  %s4116_s11 = int_to_ptr.vmem [resolvable:$true] %s2669_s11 }
  0x21   : > { %s3071_s20 = scalar_lea.vmem %s4116_s11, 1024  ;;  %p3078_p0 = scmp.lt.s32.totalorder %s4116_s11, %s3076_s28 }
  0x22   : > { %2839 = vmatmul.mubr.msk.bf16.vlgmr.msra.gmra.mrb[0].mxu0 %vm332_vm1, %v2925_v6  ;;  %2855 = vmatmul.mubr.msk.bf16.vlgmr.msra.gmra.mrb[0].mxu1 %vm332_vm1, %v2926_v7  ;;  %p3072_p11 = scmp.ne.s32.totalorder %s4116_s11, %s3071_s20  ;;  %p3079_p1 = scmp.lt.s32.totalorder %s3077_s29, %s3071_s20 }
  0x23   : > { %2842 = vmatprep.mubr.msk.bf16.mxu0 %vm332_vm1, %v2927_v8  ;;  %2858 = vmatprep.mubr.msk.bf16.mxu1 %vm332_vm1, %v2928_v9 }
  0x24   : > { %p3073_p12 = pnand %p3072_p11, %p3202_p5  ;;  %p3080_p2 = por %p3079_p1, %p3078_p0 }
  0x26   : > { %p3074_p13 = pneg %p3073_p12 }
  0x28   : > { %p3081_p3 = pnand %p3080_p2, %p3074_p13 }
  0x2a   : > { %2843 = vmatmul.mubr.msk.bf16.gmra.mrb[4].mxu0 %vm332_vm1, %v2929_v10  ;;  %2859 = vmatmul.mubr.msk.bf16.gmra.mrb[4].mxu1 %vm332_vm1, %v2930_v11 }
  0x2b   : > { %2846 = vmatprep.mubr.msk.bf16.mxu0 %vm332_vm1, %v2931_v12  ;;  %2862 = vmatprep.mubr.msk.bf16.mxu1 %vm332_vm1, %v2932_v13 }
  0x32   : > { %2847 = vmatmul.mubr.msk.bf16.gmra.mrb[8].mxu0 %vm332_vm1, %v2933_v14  ;;  %2863 = vmatmul.mubr.msk.bf16.gmra.mrb[8].mxu1 %vm332_vm1, %v2934_v15 }
  0x33   : > { %2850 = vmatprep.mubr.msk.bf16.mxu0 %vm332_vm1, %v2935_v16  ;;  %2866 = vmatprep.mubr.msk.bf16.mxu1 %vm332_vm1, %v2936_v17 }
  0x3a   : > { %2851 = vmatmul.mubr.msk.bf16.gmra.mrb[12].mxu0 %vm332_vm1, %v2937_v18  ;;  %2867 = vmatmul.mubr.msk.bf16.gmra.mrb[12].mxu1 %vm332_vm1, %v2938_v19  ;;  %v3135_v19 = vmov 1983009808  }
  0xf5   : > { %v2840_v21 = vpop.f32.mrb[0].mxu0  ;;  %v2856_v23 = vpop.f32.mrb[0].mxu1 }
  0xf6   : > { %v555_v24 = vmul.f32 %v2840_v21, %v3265_v20  ;;  %v571_v25 = vmul.f32 %v2856_v23, %v3265_v20  ;;  %v419_v26 = vpop.f32.mrb[1].mxu0  ;;  %v483_v27 = vpop.f32.mrb[1].mxu1  ;;  %v882_v21 = vunpack.c.l.s4 %v3135_v19  ;;  %v884_v23 = vlaneseq }
  0xf7   : > { %v553_v28 = vmul.f32 %v3265_v20, %v419_v26  ;;  %v569_v29 = vmul.f32 %v3265_v20, %v483_v27  ;;  %v2841_v30 = vpop.f32.mrb[2].mxu0  ;;  %v2857_v31 = vpop.f32.mrb[2].mxu1 }
  0xf8   : > { %v3277_v32 = vadd.f32 %v3270_v22, %v555_v24  ;;  %v3280_v33 = vadd.f32 %v3270_v22, %v571_v25  ;;  %v556_v34 = vmul.f32 %v2841_v30, %v3265_v20  ;;  %v572_v35 = vmul.f32 %v2857_v31, %v3265_v20  ;;  %v422_v36 = vpop.f32.mrb[3].mxu0  ;;  %v486_v37 = vpop.f32.mrb[3].mxu1 }
  0xf9   : > { %v3285_v38 = vadd.f32 %v3270_v22, %v553_v28  ;;  %v3288_v39 = vadd.f32 %v3270_v22, %v569_v29  ;;  %v554_v40 = vmul.f32 %v3265_v20, %v422_v36  ;;  %v570_v41 = vmul.f32 %v3265_v20, %v486_v37 }
  0xfa   : > { %v2777_v42 = vmul.f32 -1.442695, %v3277_v32  ;;  %v2793_v43 = vmul.f32 -1.442695, %v3280_v33  ;;  %v3295_v44 = vadd.f32 %v3270_v22, %v556_v34  ;;  %v3298_v45 = vadd.f32 %v3270_v22, %v572_v35 }
  0xfb   : > { %v2775_v46 = vmul.f32 -1.442695, %v3285_v38  ;;  %v2791_v47 = vmul.f32 -1.442695, %v3288_v39  ;;  %v3303_v48 = vadd.f32 %v3270_v22, %v554_v40  ;;  %v3306_v49 = vadd.f32 %v3270_v22, %v570_v41 }
  0xfc   : > { %2939 = vpow2.f32 %v2777_v42  ;;  %v2778_v50 = vmul.f32 -1.442695, %v3295_v44  ;;  %v2794_v51 = vmul.f32 -1.442695, %v3298_v45  ;;  %v883_v37 = vunpack.c.0.s8 %v882_v21 }
  0xfd   : > { %2941 = vpow2.f32 %v2793_v43  ;;  %v2844_v52 = vpop.f32.mrb[4].mxu0  ;;  %v2860_v53 = vpop.f32.mrb[4].mxu1  ;;  %v2776_v54 = vmul.f32 -1.442695, %v3303_v48  ;;  %v2792_v59 = vmul.f32 -1.442695, %v3306_v49 }
  0xfe   : > { %2943 = vpow2.f32 %v2775_v46  ;;  %v559_v55 = vmul.f32 %v2844_v52, %v3265_v20  ;;  %v575_v56 = vmul.f32 %v2860_v53, %v3265_v20  ;;  %v435_v57 = vpop.f32.mrb[5].mxu0  ;;  %v499_v58 = vpop.f32.mrb[5].mxu1  ;;  %v885_v40 = vshrl.u32 %v884_v23, 7 }
  0xff   : > { %2945 = vpow2.f32 %v2791_v47  ;;  %v557_v60 = vmul.f32 %v3265_v20, %v435_v57  ;;  %v573_v61 = vmul.f32 %v3265_v20, %v499_v58  ;;  %v2845_v62 = vpop.f32.mrb[6].mxu0  ;;  %v2861_v63 = vpop.f32.mrb[6].mxu1 }
 0x100   : > { %2947 = vpow2.f32 %v2778_v50  ;;  %v3317_v0 = vadd.f32 %v3270_v22, %v559_v55  ;;  %v3320_v1 = vadd.f32 %v3270_v22, %v575_v56  ;;  %v560_v2 = vmul.f32 %v2845_v62, %v3265_v20  ;;  %v438_v3 = vpop.f32.mrb[7].mxu0  ;;  %v502_v4 = vpop.f32.mrb[7].mxu1 }
 0x101   : > { %2949 = vpow2.f32 %v2794_v51  ;;  %v3324_v5 = vadd.f32 %v3270_v22, %v557_v60  ;;  %v3327_v6 = vadd.f32 %v3270_v22, %v573_v61  ;;  %v576_v27 = vmul.f32 %v2861_v63, %v3265_v20 }
 0x102   : > { %2951 = vpow2.f32 %v2776_v54  ;;  %v2781_v7 = vmul.f32 -1.442695, %v3317_v0  ;;  %v2797_v8 = vmul.f32 -1.442695, %v3320_v1  ;;  %v3332_v9 = vadd.f32 %v3270_v22, %v560_v2 }
 0x103   : > { %2953 = vpow2.f32 %v2792_v59  ;;  %v2779_v10 = vmul.f32 -1.442695, %v3324_v5  ;;  %v2795_v11 = vmul.f32 -1.442695, %v3327_v6  ;;  %v558_v30 = vmul.f32 %v3265_v20, %v438_v3 }
 0x104   : > { %2955 = vpow2.f32 %v2781_v7  ;;  %v2782_v12 = vmul.f32 -1.442695, %v3332_v9  ;;  %v574_v35 = vmul.f32 %v3265_v20, %v502_v4  ;;  %v3341_v47 = vadd.f32 %v3270_v22, %v576_v27 }
 0x105   : > { %2957 = vpow2.f32 %v2797_v8  ;;  %v2848_v42 = vpop.f32.mrb[8].mxu0  ;;  %v3345_v53 = vadd.f32 %v3270_v22, %v558_v30  ;;  %v3350_v58 = vsub.s32 %v883_v37, %v885_v40  ;;  %v2864_v61 = vpop.f32.mrb[8].mxu1 }
 0x106   : > { %v2940_v13 = vpop.eup %2939  ;;  %2959 = vpow2.f32 %v2779_v10  ;;  %4175 = vst [vmem:[#allocation5_spill] sm:$0xff] %v3341_v47  ;;  %v563_v50 = vmul.f32 %v2848_v42, %v3265_v20  ;;  %v3348_v56 = vadd.f32 %v3270_v22, %v574_v35  ;;  %v2798_v2 = vmul.f32 -1.442695, %v3341_v47 }
 0x107   : > { %v2942_v14 = vpop.eup %2941  ;;  %v722_v15 = vadd.f32 1.0, %v2940_v13  ;;  %2961 = vpow2.f32 %v2795_v11  ;;  %4176 = vst [vmem:[#allocation6_spill] sm:$0xff] %v3345_v53  ;;  %v579_v3 = vmul.f32 %v2864_v61, %v3265_v20  ;;  %v2780_v8 = vmul.f32 -1.442695, %v3345_v53 }
 0x108   : > { %v2944_v16 = vpop.eup %2943  ;;  %v738_v17 = vadd.f32 1.0, %v2942_v14  ;;  %2963 = vpow2.f32 %v2782_v12  ;;  %4177 = vst [vmem:[#allocation7_spill] sm:$0xff] %v3348_v56  ;;  %v3353_v60 = vadd.f32 %v3270_v22, %v563_v50  ;;  %v3360_v12 = vmul.f32 -1.442695, %v3348_v56 }
 0x109   : > { %v2946_v18 = vpop.eup %2945  ;;  %2965 = vrcp.f32 %v722_v15  ;;  %v720_v24 = vadd.f32 1.0, %v2944_v16  ;;  %v3367_v20 = vadd.f32 %v3270_v22, %v579_v3 }
 0x10a   : > { %v2948_v25 = vpop.eup %2947  ;;  %2967 = vrcp.f32 %v738_v17  ;;  %v736_v26 = vadd.f32 1.0, %v2946_v18  ;;  %4178 = vst [vmem:[#allocation8_spill] sm:$0xff] %v3353_v60  ;;  %v3364_v15 = vmul.f32 -1.442695, %v3353_v60 }
 0x10b   : > { %v2950_v28 = vpop.eup %2949  ;;  %2969 = vrcp.f32 %v720_v24  ;;  %v723_v29 = vadd.f32 1.0, %v2948_v25 }
 0x10c   : > { %v2952_v31 = vpop.eup %2951  ;;  %2971 = vrcp.f32 %v736_v26  ;;  %v739_v34 = vadd.f32 1.0, %v2950_v28 }
 0x10d   : > { %v2954_v36 = vpop.eup %2953  ;;  %2973 = vrcp.f32 %v723_v29  ;;  %v721_v41 = vadd.f32 1.0, %v2952_v31 }
 0x10e   : > { %v2956_v43 = vpop.eup %2955  ;;  %2975 = vrcp.f32 %v739_v34  ;;  %v737_v46 = vadd.f32 1.0, %v2954_v36 }
 0x10f   : > { %v2958_v51 = vpop.eup %2957  ;;  %2977 = vrcp.f32 %v721_v41  ;;  %v726_v52 = vadd.f32 1.0, %v2956_v43 }
 0x110   : > { %v2960_v54 = vpop.eup %2959  ;;  %2979 = vrcp.f32 %v737_v46  ;;  %v742_v55 = vadd.f32 1.0, %v2958_v51 }
 0x111   : > { %v2962_v57 = vpop.eup %2961  ;;  %2981 = vrcp.f32 %v726_v52  ;;  %v724_v59 = vadd.f32 1.0, %v2960_v54 }
 0x112   : > { %v2964_v62 = vpop.eup %2963  ;;  %2983 = vrcp.f32 %v742_v55  ;;  %v740_v63 = vadd.f32 1.0, %v2962_v57 }
 0x113   : > { %v2966_v4 = vpop.eup %2965  ;;  %2985 = vrcp.f32 %v724_v59  ;;  %v727_v7 = vadd.f32 1.0, %v2964_v62 }
 0x114   : > { %v2968_v10 = vpop.eup %2967  ;;  %v818_v11 = vmul.f32 %v2966_v4, %v3277_v32  ;;  %2987 = vrcp.f32 %v740_v63 }
 0x115   : > { %v2970_v13 = vpop.eup %2969  ;;  %v834_v14 = vmul.f32 %v2968_v10, %v3280_v33  ;;  %2989 = vrcp.f32 %v727_v7  ;;  %v3405_v10 = vpop.f32.mrb[9].mxu0 }
 0x116   : > { %v2972_v16 = vpop.eup %2971  ;;  %v914_v17 = vcombine.high %v818_v11, %v818_v11  ;;  %v921_v18 = vrot.slane %v818_v11, %v3350_v58  ;;  %v3371_v32 = vmul.f32 %v2970_v13, %v3285_v38  ;;  %2991 = vpow2.f32 %v2798_v2 }
 0x117   : > { %v3373_v19 = vpop.eup %2973  ;;  %v1186_v21 = vcombine.high %v834_v14, %v834_v14  ;;  %v1193_v33 = vrot.slane %v834_v14, %v3350_v58  ;;  %v3377_v23 = vmul.f32 %v2972_v16, %v3288_v39  ;;  %2993 = vpow2.f32 %v2780_v8 }
 0x118   : > { %v3379_v24 = vpop.eup %2975  ;;  %v928_v22 = vrot.slane %v914_v17, %v3350_v58  ;;  %v929_v25 = vcombine.high %v921_v18, %v921_v18  ;;  %v1608_v26 = vsel %vm381_vm0, %v921_v18, -inf  ;;  %v880_v38 = vcombine.high %v3371_v32, %v3371_v32 }
 0x119   : > { %v3385_v27 = vpop.eup %2977  ;;  %v1609_v28 = vrot.slane %v1608_v26, 4  ;;  %v1200_v29 = vrot.slane %v1186_v21, %v3350_v58  ;;  %v1201_v30 = vcombine.high %v1193_v33, %v1193_v33  ;;  %v2056_v39 = vsel %vm381_vm0, %v1193_v33, -inf }
 0x11a   : > { %v3389_v31 = vpop.eup %2979  ;;  %v930_v34 = vcombine.high %v928_v22, %v928_v22  ;;  %v1615_v35 = vsel %vm381_vm0, %v929_v25, -inf  ;;  %v1622_v36 = vsel %vm381_vm0, %v928_v22, -inf  ;;  %v2057_v37 = vrot.slane %v2056_v39, 4 }
 0x11b   : > { %v3393_v40 = vpop.eup %2981  ;;  %v1610_v41 = vmax.f32 %v1608_v26, %v1609_v28  ;;  %v1616_v42 = vrot.slane %v1615_v35, 4  ;;  %v1623_v43 = vrot.slane %v1622_v36, 4  ;;  %v1202_v46 = vcombine.high %v1200_v29, %v1200_v29 }
 0x11c   : > { %v3395_v50 = vpop.eup %2983  ;;  %v1629_v51 = vsel %vm381_vm0, %v930_v34, -inf  ;;  %v2058_v52 = vmax.f32 %v2056_v39, %v2057_v37  ;;  %v2063_v54 = vsel %vm381_vm0, %v1201_v30, -inf  ;;  %v2070_v55 = vsel %vm381_vm0, %v1200_v29, -inf }
 0x11d   : > { %v3400_v57 = vpop.eup %2985  ;;  %v1611_v59 = vrot.slane %v1610_v41, 2  ;;  %v1617_v61 = vmax.f32 %v1615_v35, %v1616_v42  ;;  %v1624_v62 = vmax.f32 %v1622_v36, %v1623_v43  ;;  %v1630_v63 = vrot.slane %v1629_v51, 4 }
 0x11e   : > { %v3402_v2 = vpop.eup %2987  ;;  %v2059_v3 = vrot.slane %v2058_v52, 2  ;;  %v2064_v4 = vrot.slane %v2063_v54, 4  ;;  %v2071_v7 = vrot.slane %v2070_v55, 4  ;;  %v2077_v8 = vsel %vm381_vm0, %v1202_v46, -inf }
 0x11f   : > { %v3407_v11 = vpop.eup %2989  ;;  %v1612_v13 = vmax.f32 %v1610_v41, %v1611_v59  ;;  %v1618_v14 = vrot.slane %v1617_v61, 2  ;;  %v1625_v16 = vrot.slane %v1624_v62, 2  ;;  %v1631_v17 = vmax.f32 %v1629_v51, %v1630_v63 }
 0x120   : > { %v3409_v18 = vpop.eup %2991  ;;  %v2060_v21 = vmax.f32 %v2058_v52, %v2059_v3  ;;  %v2065_v33 = vmax.f32 %v2063_v54, %v2064_v4  ;;  %v2072_v22 = vmax.f32 %v2070_v55, %v2071_v7  ;;  %v2078_v25 = vrot.slane %v2077_v8, 4 }
 0x121   : > { %v3411_v26 = vpop.eup %2993  ;;  %v1613_v28 = vrot.slane %v1612_v13, 1  ;;  %v1619_v29 = vmax.f32 %v1617_v61, %v1618_v14  ;;  %v1626_v30 = vmax.f32 %v1624_v62, %v1625_v16  ;;  %v1632_v39 = vrot.slane %v1631_v17, 2 }
 0x122   : > { %v2061_v34 = vrot.slane %v2060_v21, 1  ;;  %v2066_v35 = vrot.slane %v2065_v33, 2  ;;  %v2073_v36 = vrot.slane %v2072_v22, 2  ;;  %v2079_v37 = vmax.f32 %v2077_v8, %v2078_v25 }
 0x123   : > { %v3413_v41 = vmax.f32 %v1612_v13, %v1613_v28  ;;  %v1620_v42 = vrot.slane %v1619_v29, 1  ;;  %v1627_v43 = vrot.slane %v1626_v30, 1  ;;  %v1633_v46 = vmax.f32 %v1631_v17, %v1632_v39 }
 0x124   : > { %v3415_v51 = vmax.f32 %v2060_v21, %v2061_v34  ;;  %v2067_v52 = vmax.f32 %v2065_v33, %v2066_v35  ;;  %v2074_v54 = vmax.f32 %v2072_v22, %v2073_v36  ;;  %v2080_v55 = vrot.slane %v2079_v37, 2 }
 0x125   : > { %v3417_v59 = vmax.f32 %v1619_v29, %v1620_v42  ;;  %v3419_v63 = vmax.f32 %v1626_v30, %v1627_v43  ;;  %v1634_v61 = vrot.slane %v1633_v46, 1  ;;  %v887_v62 = vrot.slane %v3371_v32, %v3350_v58 }
 0x126   : > { %v2068_v3 = vrot.slane %v2067_v52, 1  ;;  %v2075_v4 = vrot.slane %v2074_v54, 1  ;;  %v2081_v7 = vmax.f32 %v2079_v37, %v2080_v55  ;;  %v894_v8 = vrot.slane %v880_v38, %v3350_v58 }
 0x127   : > { %v3427_v13 = vmax.f32 %v1633_v46, %v1634_v61  ;;  %v895_v14 = vcombine.high %v887_v62, %v887_v62  ;;  %v1552_v16 = vsel %vm381_vm0, %v887_v62, -inf  ;;  %v1152_v17 = vcombine.high %v3377_v23, %v3377_v23  ;;  %v3444_v46 = vpop.f32.mrb[9].mxu1 }
 0x128   : > { %v3432_v21 = vmax.f32 %v2067_v52, %v2068_v3  ;;  %v3434_v33 = vmax.f32 %v2074_v54, %v2075_v4  ;;  %v2082_v22 = vrot.slane %v2081_v7, 1  ;;  %v896_v25 = vcombine.high %v894_v8, %v894_v8 }
 0x129   : > { %v1553_v28 = vrot.slane %v1552_v16, 4  ;;  %v1559_v29 = vsel %vm381_vm0, %v895_v14, -inf  ;;  %v1566_v32 = vsel %vm381_vm0, %v894_v8, -inf  ;;  %v1159_v38 = vrot.slane %v3377_v23, %v3350_v58 }
 0x12a   : > { %v3440_v30 = vmax.f32 %v2081_v7, %v2082_v22  ;;  %v1560_v39 = vrot.slane %v1559_v29, 4  ;;  %v1567_v34 = vrot.slane %v1566_v32, 4  ;;  %v1573_v35 = vsel %vm381_vm0, %v896_v25, -inf }
 0x12b   : > { %v1554_v36 = vmax.f32 %v1552_v16, %v1553_v28  ;;  %v1574_v37 = vrot.slane %v1573_v35, 4  ;;  %v1166_v42 = vrot.slane %v1152_v17, %v3350_v58  ;;  %v1167_v43 = vcombine.high %v1159_v38, %v1159_v38 }
 0x12c   : > { %v1561_v52 = vmax.f32 %v1559_v29, %v1560_v39  ;;  %v1568_v54 = vmax.f32 %v1566_v32, %v1567_v34  ;;  %v2000_v55 = vsel %vm381_vm0, %v1159_v38, -inf  ;;  %v819_v23 = vmul.f32 %v3373_v19, %v3295_v44 }
 0x12d   : > { %v1555_v61 = vrot.slane %v1554_v36, 2  ;;  %v1575_v62 = vmax.f32 %v1573_v35, %v1574_v37  ;;  %v1168_v3 = vcombine.high %v1166_v42, %v1166_v42  ;;  %v2001_v4 = vrot.slane %v2000_v55, 4 }
 0x12e   : > { %v1562_v7 = vrot.slane %v1561_v52, 2  ;;  %v1569_v8 = vrot.slane %v1568_v54, 2  ;;  %v2007_v14 = vsel %vm381_vm0, %v1167_v43, -inf  ;;  %v2014_v16 = vsel %vm381_vm0, %v1166_v42, -inf }
 0x12f   : > { %v1556_v17 = vmax.f32 %v1554_v36, %v1555_v61  ;;  %v1576_v22 = vrot.slane %v1575_v62, 2  ;;  %v2002_v25 = vmax.f32 %v2000_v55, %v2001_v4  ;;  %v2008_v28 = vrot.slane %v2007_v14, 4 }
 0x130   : > { %v1563_v29 = vmax.f32 %v1561_v52, %v1562_v7  ;;  %v1570_v32 = vmax.f32 %v1568_v54, %v1569_v8  ;;  %v2015_v38 = vrot.slane %v2014_v16, 4  ;;  %v2021_v44 = vsel %vm381_vm0, %v1168_v3, -inf  ;;  %v3452_v54 = vpop.f32.mrb[10].mxu0 }
 0x131   : > { %v1557_v19 = vrot.slane %v1556_v17, 1  ;;  %v1577_v39 = vmax.f32 %v1575_v62, %v1576_v22  ;;  %v2003_v34 = vrot.slane %v2002_v25, 2  ;;  %v2009_v35 = vmax.f32 %v2007_v14, %v2008_v28 }
 0x132   : > { %v1564_v37 = vrot.slane %v1563_v29, 1  ;;  %v1571_v60 = vrot.slane %v1570_v32, 1  ;;  %v2016_v56 = vmax.f32 %v2014_v16, %v2015_v38  ;;  %v2022_v53 = vrot.slane %v2021_v44, 4 }
 0x133   : > { %v1558_v43 = vmax.f32 %v1556_v17, %v1557_v19  ;;  %v1578_v47 = vrot.slane %v1577_v39, 1  ;;  %v2004_v42 = vmax.f32 %v2002_v25, %v2003_v34  ;;  %v2010_v36 = vrot.slane %v2009_v35, 2 }
 0x134   : > { %v1565_v61 = vmax.f32 %v1563_v29, %v1564_v37  ;;  %v1572_v55 = vmax.f32 %v1570_v32, %v1571_v60  ;;  %v2017_v4 = vrot.slane %v2016_v56, 2  ;;  %v2023_v52 = vmax.f32 %v2021_v44, %v2022_v53 }
 0x135   : > { %v1579_v7 = vmax.f32 %v1577_v39, %v1578_v47  ;;  %v2448_v3 = vmax.f32 %v1558_v43, %v3413_v41  ;;  %v2005_v62 = vrot.slane %v2004_v42, 1  ;;  %v2011_v8 = vmax.f32 %v2009_v35, %v2010_v36 }
 0x136   : > { %v2449_v14 = vmax.f32 %v1565_v61, %v3417_v59  ;;  %v2450_v16 = vmax.f32 %v1572_v55, %v3419_v63  ;;  %v2018_v17 = vmax.f32 %v2016_v56, %v2017_v4  ;;  %v2024_v22 = vrot.slane %v2023_v52, 2 }
 0x137   : > { %v2451_v25 = vmax.f32 %v1579_v7, %v3427_v13  ;;  %v2006_v28 = vmax.f32 %v2004_v42, %v2005_v62  ;;  %v2012_v60 = vrot.slane %v2011_v8, 1  ;;  %v931_v29 = vcombine.high %v819_v23, %v819_v23 }
 0x138   : > { %v2577_v53 = vsel %vm2576_vm2, %v2449_v14, %v2448_v3  ;;  %v2019_v32 = vrot.slane %v2018_v17, 1  ;;  %v2025_v47 = vmax.f32 %v2023_v52, %v2024_v22  ;;  %v938_v41 = vrot.slane %v819_v23, %v3350_v58 }
 0x139   : > { %v2579_v38 = vsel %vm2578_vm3, %v2450_v16, %v2577_v53  ;;  %v2013_v44 = vmax.f32 %v2011_v8, %v2012_v60  ;;  %v2480_v59 = vmax.f32 %v2006_v28, %v3415_v51  ;;  %v945_v63 = vrot.slane %v931_v29, %v3350_v58  ;;  %v3477_v8 = vpop.f32.mrb[10].mxu1 }
 0x13a   : > { %v2020_v56 = vmax.f32 %v2018_v17, %v2019_v32  ;;  %v2026_v19 = vrot.slane %v2025_v47, 1  ;;  %v946_v39 = vcombine.high %v938_v41, %v938_v41  ;;  %v1636_v13 = vsel %vm381_vm0, %v938_v41, -inf }
 0x13b   : > { %v2481_v34 = vmax.f32 %v2013_v44, %v3432_v21  ;;  %v947_v35 = vcombine.high %v945_v63, %v945_v63  ;;  %v1637_v37 = vrot.slane %v1636_v13, 4  ;;  %v1650_v43 = vsel %vm381_vm0, %v945_v63, -inf }
 0x13c   : > { %v3466_v42 = vmax.f32 %v2025_v47, %v2026_v19  ;;  %v2482_v23 = vmax.f32 %v2020_v56, %v3434_v33  ;;  %v1643_v36 = vsel %vm381_vm0, %v946_v39, -inf  ;;  %v1651_v51 = vrot.slane %v1650_v43, 4 }
 0x13d   : > { %v2611_v61 = vsel %vm2576_vm2, %v2481_v34, %v2480_v59  ;;  %v1638_v55 = vmax.f32 %v1636_v13, %v1637_v37  ;;  %v1644_v4 = vrot.slane %v1643_v36, 4  ;;  %v1657_v52 = vsel %vm381_vm0, %v947_v35, -inf }
 0x13e   : > { %v2483_v21 = vmax.f32 %v3466_v42, %v3440_v30  ;;  %v3475_v7 = vsel %vm2578_vm3, %v2482_v23, %v2611_v61  ;;  %v1652_v3 = vmax.f32 %v1650_v43, %v1651_v51  ;;  %v1658_v62 = vrot.slane %v1657_v52, 4  ;;  %v3535_v30 = vpop.f32.mrb[11].mxu1 }
 0x13f   : > { %v1639_v33 = vrot.slane %v1638_v55, 2  ;;  %v1645_v14 = vmax.f32 %v1643_v36, %v1644_v4  ;;  %v835_v16 = vmul.f32 %v3379_v24, %v3298_v45  ;;  %v817_v17 = vmul.f32 %v3385_v27, %v3303_v48 }
 0x140   : > { %v1653_v22 = vrot.slane %v1652_v3, 2  ;;  %v1659_v28 = vmax.f32 %v1657_v52, %v1658_v62  ;;  %v3484_v60 = vsel %vm2580_vm4, %v2451_v25, %v2579_v38  ;;  %v3488_v29 = vmul.f32 %v3389_v31, %v3306_v49 }
 0x141   : > { %v1640_v53 = vmax.f32 %v1638_v55, %v1639_v33  ;;  %v1646_v32 = vrot.slane %v1645_v14, 2  ;;  %v1203_v47 = vcombine.high %v835_v16, %v835_v16  ;;  %v1210_v41 = vrot.slane %v835_v16, %v3350_v58 }
 0x142   : > { %v1654_v44 = vmax.f32 %v1652_v3, %v1653_v22  ;;  %v1660_v59 = vrot.slane %v1659_v28, 2  ;;  %v897_v45 = vcombine.high %v817_v17, %v817_v17  ;;  %v904_v24 = vrot.slane %v817_v17, %v3350_v58  ;;  %v3506_v22 = vpop.f32.mrb[11].mxu0 }
 0x143   : > { %v1641_v48 = vrot.slane %v1640_v53, 1  ;;  %v1647_v27 = vmax.f32 %v1645_v14, %v1646_v32  ;;  %v1217_v63 = vrot.slane %v1203_v47, %v3350_v58  ;;  %v1218_v25 = vcombine.high %v1210_v41, %v1210_v41 }
 0x144   : > { %v1655_v38 = vrot.slane %v1654_v44, 1  ;;  %v1661_v56 = vmax.f32 %v1659_v28, %v1660_v59  ;;  %v2084_v49 = vsel %vm381_vm0, %v1210_v41, -inf  ;;  %v911_v31 = vrot.slane %v897_v45, %v3350_v58 }
 0x145   : > { %v3495_v19 = vmax.f32 %v1640_v53, %v1641_v48  ;;  %v1648_v39 = vrot.slane %v1647_v27, 1  ;;  %v1219_v13 = vcombine.high %v1217_v63, %v1217_v63  ;;  %v2085_v34 = vrot.slane %v2084_v49, 4 }
 0x146   : > { %v3497_v35 = vmax.f32 %v1654_v44, %v1655_v38  ;;  %v1662_v37 = vrot.slane %v1661_v56, 1  ;;  %v2091_v43 = vsel %vm381_vm0, %v1218_v25, -inf  ;;  %v2098_v23 = vsel %vm381_vm0, %v1217_v63, -inf }
 0x147   : > { %v3501_v36 = vmax.f32 %v1647_v27, %v1648_v39  ;;  %v2086_v51 = vmax.f32 %v2084_v49, %v2085_v34  ;;  %v2092_v61 = vrot.slane %v2091_v43, 4  ;;  %v2099_v55 = vrot.slane %v2098_v23, 4 }
 0x148   : > { %v3503_v4 = vmax.f32 %v1661_v56, %v1662_v37  ;;  %v2105_v52 = vsel %vm381_vm0, %v1219_v13, -inf  ;;  %v912_v3 = vcombine.high %v904_v24, %v904_v24  ;;  %v913_v62 = vcombine.high %v911_v31, %v911_v31 }
 0x149   : > { %v2087_v33 = vrot.slane %v2086_v51, 2  ;;  %v2093_v14 = vmax.f32 %v2091_v43, %v2092_v61  ;;  %v2100_v16 = vmax.f32 %v2098_v23, %v2099_v55  ;;  %v2106_v17 = vrot.slane %v2105_v52, 4 }
 0x14a   : > { %v1580_v28 = vsel %vm381_vm0, %v904_v24, -inf  ;;  %v1587_v53 = vsel %vm381_vm0, %v912_v3, -inf  ;;  %v1594_v32 = vsel %vm381_vm0, %v911_v31, -inf  ;;  %v1601_v47 = vsel %vm381_vm0, %v913_v62, -inf }
 0x14b   : > { %v2088_v41 = vmax.f32 %v2086_v51, %v2087_v33  ;;  %v2094_v44 = vrot.slane %v2093_v14, 2  ;;  %v2101_v59 = vrot.slane %v2100_v16, 2  ;;  %v2107_v45 = vmax.f32 %v2105_v52, %v2106_v17 }
 0x14c   : > { %v1581_v48 = vrot.slane %v1580_v28, 4  ;;  %v1588_v27 = vrot.slane %v1587_v53, 4  ;;  %v1595_v63 = vrot.slane %v1594_v32, 4  ;;  %v1602_v25 = vrot.slane %v1601_v47, 4 }
 0x14d   : > { %v2089_v38 = vrot.slane %v2088_v41, 1  ;;  %v2095_v56 = vmax.f32 %v2093_v14, %v2094_v44  ;;  %v2102_v49 = vmax.f32 %v2100_v16, %v2101_v59  ;;  %v2108_v39 = vrot.slane %v2107_v45, 2 }
 0x14e   : > { %v1582_v13 = vmax.f32 %v1580_v28, %v1581_v48  ;;  %v1589_v24 = vmax.f32 %v1587_v53, %v1588_v27  ;;  %v1596_v34 = vmax.f32 %v1594_v32, %v1595_v63  ;;  %v1603_v37 = vmax.f32 %v1601_v47, %v1602_v25 }
 0x14f   : > { %v3512_v43 = vmax.f32 %v2088_v41, %v2089_v38  ;;  %v2096_v31 = vrot.slane %v2095_v56, 1  ;;  %v2103_v23 = vrot.slane %v2102_v49, 1  ;;  %v2109_v51 = vmax.f32 %v2107_v45, %v2108_v39 }
 0x150   : > { %v1583_v61 = vrot.slane %v1582_v13, 2  ;;  %v1590_v55 = vrot.slane %v1589_v24, 2  ;;  %v1597_v52 = vrot.slane %v1596_v34, 2  ;;  %v1604_v3 = vrot.slane %v1603_v37, 2 }
 0x151   : > { %v3514_v62 = vmax.f32 %v2095_v56, %v2096_v31  ;;  %v3516_v33 = vmax.f32 %v2102_v49, %v2103_v23  ;;  %v2110_v14 = vrot.slane %v2109_v51, 1  ;;  %v1169_v16 = vcombine.high %v3488_v29, %v3488_v29 }
 0x152   : > { %v1584_v17 = vmax.f32 %v1582_v13, %v1583_v61  ;;  %v1591_v28 = vmax.f32 %v1589_v24, %v1590_v55  ;;  %v1598_v53 = vmax.f32 %v1596_v34, %v1597_v52  ;;  %v1605_v32 = vmax.f32 %v1603_v37, %v1604_v3 }
 0x153   : > { %v3520_v47 = vmax.f32 %v2109_v51, %v2110_v14  ;;  %v1176_v41 = vrot.slane %v3488_v29, %v3350_v58  ;;  %v1183_v44 = vrot.slane %v1169_v16, %v3350_v58  ;;  %v3530_v59 = vsel %vm2580_vm4, %v2483_v21, %v3475_v7 }
 0x154   : > { %v1585_v45 = vrot.slane %v1584_v17, 1  ;;  %v1592_v48 = vrot.slane %v1591_v28, 1  ;;  %v1599_v27 = vrot.slane %v1598_v53, 1  ;;  %v1606_v63 = vrot.slane %v1605_v32, 1 }
 0x155   : > { %v1184_v25 = vcombine.high %v1176_v41, %v1176_v41  ;;  %v1185_v38 = vcombine.high %v1183_v44, %v1183_v44  ;;  %v2028_v56 = vsel %vm381_vm0, %v1176_v41, -inf  ;;  %v2042_v29 = vsel %vm381_vm0, %v1183_v44, -inf }
 0x156   : > { %v1586_v49 = vmax.f32 %v1584_v17, %v1585_v45  ;;  %v1593_v39 = vmax.f32 %v1591_v28, %v1592_v48  ;;  %v1600_v13 = vmax.f32 %v1598_v53, %v1599_v27  ;;  %v1607_v24 = vmax.f32 %v1605_v32, %v1606_v63 }
 0x157   : > { %v2029_v42 = vrot.slane %v2028_v56, 4  ;;  %v2035_v21 = vsel %vm381_vm0, %v1184_v25, -inf  ;;  %v2043_v7 = vrot.slane %v2042_v29, 4  ;;  %v2049_v34 = vsel %vm381_vm0, %v1185_v38, -inf }
 0x158   : > { %v2452_v37 = vmax.f32 %v1586_v49, %v3495_v19  ;;  %v2453_v31 = vmax.f32 %v1593_v39, %v3501_v36  ;;  %v2454_v23 = vmax.f32 %v1600_v13, %v3497_v35  ;;  %v2455_v51 = vmax.f32 %v1607_v24, %v3503_v4 }
 0x159   : > { %v2030_v61 = vmax.f32 %v2028_v56, %v2029_v42  ;;  %v2036_v55 = vrot.slane %v2035_v21, 4  ;;  %v2044_v52 = vmax.f32 %v2042_v29, %v2043_v7  ;;  %v2050_v3 = vrot.slane %v2049_v34, 4 }
 0x15a   : > { %v2583_v14 = vsel %vm2582_vm5, %v2452_v37, %v3484_v60  ;;  %v822_v16 = vmul.f32 %v3393_v40, %v3317_v0  ;;  %v838_v17 = vmul.f32 %v3395_v50, %v3320_v1  ;;  %v3553_v19 = vmul.f32 %v3400_v57, %v3324_v5 }
 0x15b   : > { %v2585_v35 = vsel %vm2584_vm6, %v2453_v31, %v2583_v14  ;;  %v2031_v36 = vrot.slane %v2030_v61, 2  ;;  %v2037_v4 = vmax.f32 %v2035_v21, %v2036_v55  ;;  %v2045_v28 = vrot.slane %v2044_v52, 2  ;;  %v3569_v55 = vpop.f32.mrb[12].mxu0 }
 0x15c   : > { %v2587_v53 = vsel %vm2586_vm7, %v2454_v23, %v2585_v35  ;;  %v2051_v32 = vmax.f32 %v2049_v34, %v2050_v3  ;;  %v982_v41 = vcombine.high %v822_v16, %v822_v16  ;;  %v989_v60 = vrot.slane %v822_v16, %v3350_v58 }
 0x15d   : > { %v2589_v0 = vsel %vm2588_vm8, %v2455_v51, %v2587_v53  ;;  %v2032_v40 = vmax.f32 %v2030_v61, %v2031_v36  ;;  %v2038_v44 = vrot.slane %v2037_v4, 2  ;;  %v2046_v1 = vmax.f32 %v2044_v52, %v2045_v28 }
 0x15e   : > { %2647 = vst [vmem:[%s3559_s27] sm:$0xff] %v2589_v0  ;;  %v2052_v5 = vrot.slane %v2051_v32, 2  ;;  %v996_v50 = vrot.slane %v982_v41, %v3350_v58  ;;  %v997_v57 = vcombine.high %v989_v60, %v989_v60  ;;  %v1720_v45 = vsel %vm381_vm0, %v989_v60, -inf }
 0x15f   : > { %v2033_v48 = vrot.slane %v2032_v40, 1  ;;  %v2039_v27 = vmax.f32 %v2037_v4, %v2038_v44  ;;  %v2047_v63 = vrot.slane %v2046_v1, 1  ;;  %v1721_v25 = vrot.slane %v1720_v45, 4 }
 0x160   : > { %v2053_v38 = vmax.f32 %v2051_v32, %v2052_v5  ;;  %v998_v56 = vcombine.high %v996_v50, %v996_v50  ;;  %v1727_v29 = vsel %vm381_vm0, %v997_v57, -inf  ;;  %v1734_v49 = vsel %vm381_vm0, %v996_v50, -inf }
 0x161   : > { %v2034_v39 = vmax.f32 %v2032_v40, %v2033_v48  ;;  %v2040_v13 = vrot.slane %v2039_v27, 1  ;;  %v2048_v24 = vmax.f32 %v2046_v1, %v2047_v63  ;;  %v1722_v42 = vmax.f32 %v1720_v45, %v1721_v25 }
 0x162   : > { %v2054_v21 = vrot.slane %v2053_v38, 1  ;;  %v1728_v7 = vrot.slane %v1727_v29, 4  ;;  %v1735_v34 = vrot.slane %v1734_v49, 4  ;;  %v1741_v37 = vsel %vm381_vm0, %v998_v56, -inf }
 0x163   : > { %v2041_v31 = vmax.f32 %v2039_v27, %v2040_v13  ;;  %v2484_v23 = vmax.f32 %v2034_v39, %v3512_v43  ;;  %v2486_v51 = vmax.f32 %v2048_v24, %v3516_v33  ;;  %v1723_v61 = vrot.slane %v1722_v42, 2 }
 0x164   : > { %v2055_v52 = vmax.f32 %v2053_v38, %v2054_v21  ;;  %v1729_v3 = vmax.f32 %v1727_v29, %v1728_v7  ;;  %v1736_v14 = vmax.f32 %v1734_v49, %v1735_v34  ;;  %v1742_v16 = vrot.slane %v1741_v37, 4  ;;  %v3587_v29 = vpop.f32.mrb[12].mxu1 }
 0x165   : > { %v2485_v35 = vmax.f32 %v2041_v31, %v3514_v62  ;;  %v2614_v36 = vsel %vm2582_vm5, %v2484_v23, %v3530_v59  ;;  %v1724_v4 = vmax.f32 %v1722_v42, %v1723_v61  ;;  %v1254_v28 = vcombine.high %v838_v17, %v838_v17 }
 0x166   : > { %v2487_v53 = vmax.f32 %v2055_v52, %v3520_v47  ;;  %v1730_v43 = vrot.slane %v1729_v3, 2  ;;  %v1737_v32 = vrot.slane %v1736_v14, 2  ;;  %v1743_v33 = vmax.f32 %v1741_v37, %v1742_v16 }
 0x167   : > { %v2615_v41 = vsel %vm2584_vm6, %v2485_v35, %v2614_v36  ;;  %v1725_v60 = vrot.slane %v1724_v4, 1  ;;  %v1261_v0 = vrot.slane %v838_v17, %v3350_v58  ;;  %v1268_v40 = vrot.slane %v1254_v28, %v3350_v58 }
 0x168   : > { %v2616_v62 = vsel %vm2586_vm7, %v2486_v51, %v2615_v41  ;;  %v1731_v44 = vmax.f32 %v1729_v3, %v1730_v43  ;;  %v1738_v1 = vmax.f32 %v1736_v14, %v1737_v32  ;;  %v1744_v59 = vrot.slane %v1743_v33, 2 }
 0x169   : > { %v2617_v5 = vsel %vm2588_vm8, %v2487_v53, %v2616_v62  ;;  %v3580_v50 = vmax.f32 %v1724_v4, %v1725_v60  ;;  %v1269_v47 = vcombine.high %v1261_v0, %v1261_v0  ;;  %v1270_v57 = vcombine.high %v1268_v40, %v1268_v40 }
 0x16a   : > { %2651 = vst [vmem:[%s3559_s27 + $0x20] sm:$0xff] %v2617_v5  ;;  %v1732_v45 = vrot.slane %v1731_v44, 1  ;;  %v1739_v48 = vrot.slane %v1738_v1, 1  ;;  %v1745_v27 = vmax.f32 %v1743_v33, %v1744_v59  ;;  %v2168_v63 = vsel %vm381_vm0, %v1261_v0, -inf }
 0x16b   : > { %v2169_v17 = vrot.slane %v2168_v63, 4  ;;  %v2175_v25 = vsel %vm381_vm0, %v1269_v47, -inf  ;;  %v2182_v38 = vsel %vm381_vm0, %v1268_v40, -inf  ;;  %v2189_v56 = vsel %vm381_vm0, %v1270_v57, -inf }
 0x16c   : > { %v3589_v49 = vmax.f32 %v1731_v44, %v1732_v45  ;;  %v3591_v39 = vmax.f32 %v1738_v1, %v1739_v48  ;;  %v1746_v13 = vrot.slane %v1745_v27, 1  ;;  %v2176_v24 = vrot.slane %v2175_v25, 4  ;;  %v3608_v48 = vpop.f32.mrb[13].mxu0 }
 0x16d   : > { %v2170_v42 = vmax.f32 %v2168_v63, %v2169_v17  ;;  %v2183_v21 = vrot.slane %v2182_v38, 4  ;;  %v2190_v7 = vrot.slane %v2189_v56, 4  ;;  %v948_v34 = vcombine.high %v3553_v19, %v3553_v19 }
 0x16e   : > { %v3595_v37 = vmax.f32 %v1745_v27, %v1746_v13  ;;  %v2177_v31 = vmax.f32 %v2175_v25, %v2176_v24  ;;  %v955_v23 = vrot.slane %v3553_v19, %v3350_v58  ;;  %v836_v51 = vmul.f32 %v3402_v2, %v3327_v6 }
 0x16f   : > { %v2171_v61 = vrot.slane %v2170_v42, 2  ;;  %v2184_v52 = vmax.f32 %v2182_v38, %v2183_v21  ;;  %v2191_v3 = vmax.f32 %v2189_v56, %v2190_v7  ;;  %v962_v14 = vrot.slane %v948_v34, %v3350_v58 }
 0x170   : > { %v2178_v16 = vrot.slane %v2177_v31, 2  ;;  %v963_v35 = vcombine.high %v955_v23, %v955_v23  ;;  %v1664_v36 = vsel %vm381_vm0, %v955_v23, -inf  ;;  %v1220_v4 = vcombine.high %v836_v51, %v836_v51 }
 0x171   : > { %v2172_v28 = vmax.f32 %v2170_v42, %v2171_v61  ;;  %v2185_v53 = vrot.slane %v2184_v52, 2  ;;  %v2192_v43 = vrot.slane %v2191_v3, 2  ;;  %v964_v32 = vcombine.high %v962_v14, %v962_v14 }
 0x172   : > { %v2179_v33 = vmax.f32 %v2177_v31, %v2178_v16  ;;  %v1665_v41 = vrot.slane %v1664_v36, 4  ;;  %v1671_v19 = vsel %vm381_vm0, %v963_v35, -inf  ;;  %v1678_v6 = vsel %vm381_vm0, %v962_v14, -inf }
 0x173   : > { %v2173_v2 = vrot.slane %v2172_v28, 1  ;;  %v2186_v60 = vmax.f32 %v2184_v52, %v2185_v53  ;;  %v2193_v0 = vmax.f32 %v2191_v3, %v2192_v43  ;;  %v1672_v40 = vrot.slane %v1671_v19, 4  ;;  %v3623_v43 = vpop.f32.mrb[13].mxu1 }
 0x174   : > { %v2180_v62 = vrot.slane %v2179_v33, 1  ;;  %v1666_v44 = vmax.f32 %v1664_v36, %v1665_v41  ;;  %v1679_v1 = vrot.slane %v1678_v6, 4  ;;  %v1685_v59 = vsel %vm381_vm0, %v964_v32, -inf }
 0x175   : > { %v3606_v5 = vmax.f32 %v2172_v28, %v2173_v2  ;;  %v2187_v47 = vrot.slane %v2186_v60, 1  ;;  %v2194_v57 = vrot.slane %v2193_v0, 1  ;;  %v1673_v45 = vmax.f32 %v1671_v19, %v1672_v40 }
 0x176   : > { %v3610_v27 = vmax.f32 %v2179_v33, %v2180_v62  ;;  %v1667_v63 = vrot.slane %v1666_v44, 2  ;;  %v1680_v17 = vmax.f32 %v1678_v6, %v1679_v1  ;;  %v1686_v25 = vrot.slane %v1685_v59, 4 }
 0x177   : > { %v3612_v38 = vmax.f32 %v2186_v60, %v2187_v47  ;;  %v3614_v56 = vmax.f32 %v2193_v0, %v2194_v57  ;;  %v1674_v13 = vrot.slane %v1673_v45, 2  ;;  %v1227_v24 = vrot.slane %v836_v51, %v3350_v58 }
 0x178   : > { %v1668_v42 = vmax.f32 %v1666_v44, %v1667_v63  ;;  %v1681_v21 = vrot.slane %v1680_v17, 2  ;;  %v1687_v7 = vmax.f32 %v1685_v59, %v1686_v25  ;;  %v1234_v34 = vrot.slane %v1220_v4, %v3350_v58 }
 0x179   : > { %v1675_v31 = vmax.f32 %v1673_v45, %v1674_v13  ;;  %v1235_v23 = vcombine.high %v1227_v24, %v1227_v24  ;;  %v2112_v61 = vsel %vm381_vm0, %v1227_v24, -inf  ;;  %v823_v52 = vmul.f32 %v3407_v11, %v3332_v9 }
 0x17a   : > { %v1669_v3 = vrot.slane %v1668_v42, 1  ;;  %v1682_v14 = vmax.f32 %v1680_v17, %v1681_v21  ;;  %v1688_v16 = vrot.slane %v1687_v7, 2  ;;  %v1236_v35 = vcombine.high %v1234_v34, %v1234_v34 }
 0x17b   : > { %v1676_v36 = vrot.slane %v1675_v31, 1  ;;  %v2113_v28 = vrot.slane %v2112_v61, 4  ;;  %v2119_v51 = vsel %vm381_vm0, %v1235_v23, -inf  ;;  %v2126_v53 = vsel %vm381_vm0, %v1234_v34, -inf }
 0x17c   : > { %v1670_v4 = vmax.f32 %v1668_v42, %v1669_v3  ;;  %v1683_v32 = vrot.slane %v1682_v14, 1  ;;  %v1689_v33 = vmax.f32 %v1687_v7, %v1688_v16  ;;  %v2120_v41 = vrot.slane %v2119_v51, 4 }
 0x17d   : > { %v1677_v19 = vmax.f32 %v1675_v31, %v1676_v36  ;;  %v2114_v6 = vmax.f32 %v2112_v61, %v2113_v28  ;;  %v2127_v2 = vrot.slane %v2126_v53, 4  ;;  %v2133_v9 = vsel %vm381_vm0, %v1236_v35, -inf }
 0x17e   : > { %v1684_v11 = vmax.f32 %v1682_v14, %v1683_v32  ;;  %v1690_v60 = vrot.slane %v1689_v33, 1  ;;  %v2456_v0 = vmax.f32 %v1670_v4, %v3580_v50  ;;  %v2121_v40 = vmax.f32 %v2119_v51, %v2120_v41  ;;  %v3638_v4 = vpop.f32.mrb[14].mxu0 }
 0x17f   : > { %v2457_v62 = vmax.f32 %v1677_v19, %v3589_v49  ;;  %v2115_v44 = vrot.slane %v2114_v6, 2  ;;  %v2128_v1 = vmax.f32 %v2126_v53, %v2127_v2  ;;  %v2134_v59 = vrot.slane %v2133_v9, 4 }
 0x180   : > { %v1691_v47 = vmax.f32 %v1689_v33, %v1690_v60  ;;  %v2458_v57 = vmax.f32 %v1684_v11, %v3591_v39  ;;  %v2122_v45 = vrot.slane %v2121_v40, 2  ;;  %v999_v63 = vcombine.high %v823_v52, %v823_v52 }
 0x181   : > { %v2590_v17 = vsel %vm2576_vm2, %v2457_v62, %v2456_v0  ;;  %v2116_v25 = vmax.f32 %v2114_v6, %v2115_v44  ;;  %v2129_v13 = vrot.slane %v2128_v1, 2  ;;  %v2135_v24 = vmax.f32 %v2133_v9, %v2134_v59 }
 0x182   : > { %v2459_v42 = vmax.f32 %v1691_v47, %v3595_v37  ;;  %v2591_v50 = vsel %vm2578_vm3, %v2458_v57, %v2590_v17  ;;  %v2123_v21 = vmax.f32 %v2121_v40, %v2122_v45  ;;  %v1006_v49 = vrot.slane %v823_v52, %v3350_v58 }
 0x183   : > { %v2117_v7 = vrot.slane %v2116_v25, 1  ;;  %v2130_v34 = vmax.f32 %v2128_v1, %v2129_v13  ;;  %v2136_v31 = vrot.slane %v2135_v24, 2  ;;  %v1013_v23 = vrot.slane %v999_v63, %v3350_v58 }
 0x184   : > { %v2124_v39 = vrot.slane %v2123_v21, 1  ;;  %v1014_v61 = vcombine.high %v1006_v49, %v1006_v49  ;;  %v1748_v3 = vsel %vm381_vm0, %v1006_v49, -inf  ;;  %v743_v14 = vadd.f32 1.0, %v3409_v18 }
 0x185   : > { %v2118_v16 = vmax.f32 %v2116_v25, %v2117_v7  ;;  %v2131_v35 = vrot.slane %v2130_v34, 1  ;;  %v2137_v36 = vmax.f32 %v2135_v24, %v2136_v31  ;;  %v1015_v37 = vcombine.high %v1013_v23, %v1013_v23 }
 0x186   : > { %v2125_v28 = vmax.f32 %v2123_v21, %v2124_v39  ;;  %v1749_v51 = vrot.slane %v1748_v3, 4  ;;  %v1755_v53 = vsel %vm381_vm0, %v1014_v61, -inf  ;;  %v1762_v52 = vsel %vm381_vm0, %v1013_v23, -inf }
 0x187   : > { %v2132_v32 = vmax.f32 %v2130_v34, %v2131_v35  ;;  %v2138_v33 = vrot.slane %v2137_v36, 1  ;;  %v2488_v41 = vmax.f32 %v2118_v16, %v3606_v5  ;;  %v1756_v19 = vrot.slane %v1755_v53, 4 }
 0x188   : > { %v2489_v6 = vmax.f32 %v2125_v28, %v3610_v27  ;;  %v1750_v18 = vmax.f32 %v1748_v3, %v1749_v51  ;;  %v1763_v2 = vrot.slane %v1762_v52, 4  ;;  %v1769_v9 = vsel %vm381_vm0, %v1015_v37, -inf  ;;  %v4179_v51 = vld [vmem:[#allocation5_spill] sm:$0xff] }
 0x189   : > { %v2139_v11 = vmax.f32 %v2137_v36, %v2138_v33  ;;  %v2490_v60 = vmax.f32 %v2132_v32, %v3612_v38  ;;  %v1757_v0 = vmax.f32 %v1755_v53, %v1756_v19  ;;  %v1770_v40 = vrot.slane %v1769_v9, 4 }
 0x18a   : > { %v2618_v62 = vsel %vm2576_vm2, %v2489_v6, %v2488_v41  ;;  %v1751_v44 = vrot.slane %v1750_v18, 2  ;;  %v1764_v1 = vmax.f32 %v1762_v52, %v1763_v2  ;;  %2995 = vrcp.f32 %v743_v14 }
 0x18b   : > { %v2491_v59 = vmax.f32 %v2139_v11, %v3614_v56  ;;  %v2619_v5 = vsel %vm2578_vm3, %v2490_v60, %v2618_v62  ;;  %v1758_v47 = vrot.slane %v1757_v0, 2  ;;  %v1771_v27 = vmax.f32 %v1769_v9, %v1770_v40 }
 0x18c   : > { %v1752_v57 = vmax.f32 %v1750_v18, %v1751_v44  ;;  %v1765_v45 = vrot.slane %v1764_v1, 2  ;;  %v725_v63 = vadd.f32 1.0, %v3411_v26  ;;  %v3649_v17 = vsel %vm2580_vm4, %v2459_v42, %v2591_v50  ;;  %v3660_v26 = vld [vmem:[%s4166_s2] ss:$0 sm:$0xff]  ;;  %v3664_v42 = vpop.f32.mrb[14].mxu1 }
 0x18d   : > { %v1759_v38 = vmax.f32 %v1757_v0, %v1758_v47  ;;  %v1772_v25 = vrot.slane %v1771_v27, 2  ;;  %2997 = vpow2.f32 %v3360_v12  ;;  %v3653_v13 = vsel %vm2580_vm4, %v2491_v59, %v2619_v5 }
 0x18e   : > { %v1753_v24 = vrot.slane %v1752_v57, 1  ;;  %v1766_v56 = vmax.f32 %v1764_v1, %v1765_v45  ;;  %2999 = vrcp.f32 %v725_v63  ;;  %v2801_v21 = vmul.f32 -1.442695, %v3367_v20  ;;  %v4180_v1 = vld [vmem:[#allocation6_spill] sm:$0xff] }
 0x18f   : > { %v1760_v49 = vrot.slane %v1759_v38, 1  ;;  %v1773_v7 = vmax.f32 %v1771_v27, %v1772_v25  ;;  %3001 = vpow2.f32 %v3364_v15  ;;  %v561_v12 = vmul.f32 %v3660_v26, %v3405_v10  ;;  %v3673_v15 = vld [vmem:[%s4167_s3] ss:$0 sm:$0xff] }
 0x190   : > { %3003 = vpow2.f32 %v2801_v21  ;;  %v577_v50 = vmul.f32 %v3660_v26, %v3444_v46  ;;  %v3668_v34 = vmax.f32 %v1752_v57, %v1753_v24  ;;  %v1767_v31 = vrot.slane %v1766_v56, 1 }
 0x191   : > { %v3676_v23 = vadd.f32 %v3673_v15, %v561_v12  ;;  %v564_v10 = vmul.f32 %v3660_v26, %v3452_v54  ;;  %v1774_v39 = vrot.slane %v1773_v7, 1  ;;  %v580_v46 = vmul.f32 %v3660_v26, %v3477_v8 }
 0x192   : > { %v3681_v61 = vadd.f32 %v3673_v15, %v577_v50  ;;  %v562_v3 = vmul.f32 %v3660_v26, %v3506_v22  ;;  %v3687_v14 = vmax.f32 %v1759_v38, %v1760_v49  ;;  %v578_v54 = vmul.f32 %v3660_v26, %v3535_v30 }
 0x193   : > { %v2783_v16 = vmul.f32 -1.442695, %v3676_v23  ;;  %v3691_v35 = vadd.f32 %v3673_v15, %v564_v10  ;;  %v3697_v28 = vadd.f32 %v3673_v15, %v580_v46  ;;  %v567_v22 = vmul.f32 %v3660_v26, %v3569_v55 }
 0x194   : > { %v2996_v36 = vpop.eup %2995  ;;  %v2799_v37 = vmul.f32 -1.442695, %v3681_v61  ;;  %v3700_v8 = vadd.f32 %v3673_v15, %v562_v3  ;;  %v3707_v32 = vadd.f32 %v3673_v15, %v578_v54  ;;  %v3709_v30 = vmax.f32 %v1766_v56, %v1767_v31 }
 0x195   : > { %v839_v53 = vmul.f32 %v2996_v36, %v4179_v51  ;;  %3005 = vpow2.f32 %v2783_v16  ;;  %v2786_v52 = vmul.f32 -1.442695, %v3691_v35  ;;  %v3711_v33 = vmax.f32 %v1773_v7, %v1774_v39 }
 0x196   : > { %3007 = vpow2.f32 %v2799_v37  ;;  %v2802_v41 = vmul.f32 -1.442695, %v3697_v28  ;;  %v3716_v55 = vmul.f32 -1.442695, %v3700_v8  ;;  %v3719_v11 = vmul.f32 -1.442695, %v3707_v32 }
 0x197   : > { %v2998_v19 = vpop.eup %2997  ;;  %v1271_v6 = vcombine.high %v839_v53, %v839_v53  ;;  %v1278_v18 = vrot.slane %v839_v53, %v3350_v58  ;;  %3009 = vpow2.f32 %v2786_v52  ;;  %v3722_v60 = vadd.f32 %v3673_v15, %v567_v22 }
 0x198   : > { %v3000_v2 = vpop.eup %2999  ;;  %v741_v9 = vadd.f32 1.0, %v2998_v19  ;;  %3011 = vpow2.f32 %v2802_v41  ;;  %v3729_v57 = vmul.f32 %v3660_v26, %v3587_v29 }
 0x199   : > { %v3002_v0 = vpop.eup %3001  ;;  %v1285_v40 = vrot.slane %v1271_v6, %v3350_v58  ;;  %v1286_v62 = vcombine.high %v1278_v18, %v1278_v18  ;;  %v2196_v44 = vsel %vm381_vm0, %v1278_v18, -inf  ;;  %v821_v59 = vmul.f32 %v3000_v2, %v4180_v1 }
 0x19a   : > { %v3004_v5 = vpop.eup %3003  ;;  %v2197_v47 = vrot.slane %v2196_v44, 4  ;;  %3013 = vrcp.f32 %v741_v9  ;;  %v730_v27 = vadd.f32 1.0, %v3002_v0 }
 0x19b   : > { %v1287_v45 = vcombine.high %v1285_v40, %v1285_v40  ;;  %v2203_v63 = vsel %vm381_vm0, %v1286_v62, -inf  ;;  %v2210_v38 = vsel %vm381_vm0, %v1285_v40, -inf  ;;  %v965_v25 = vcombine.high %v821_v59, %v821_v59 }
 0x19c   : > { %v2198_v24 = vmax.f32 %v2196_v44, %v2197_v47  ;;  %v2204_v56 = vrot.slane %v2203_v63, 4  ;;  %v2211_v21 = vrot.slane %v2210_v38, 4  ;;  %v972_v49 = vrot.slane %v821_v59, %v3350_v58 }
 0x19d   : > { %v2217_v7 = vsel %vm381_vm0, %v1287_v45, -inf  ;;  %v979_v12 = vrot.slane %v965_v25, %v3350_v58  ;;  %3015 = vrcp.f32 %v730_v27  ;;  %v3736_v50 = vadd.f32 1.0, %v3004_v5 }
 0x19e   : > { %v2199_v29 = vrot.slane %v2198_v24, 2  ;;  %v2205_v31 = vmax.f32 %v2203_v63, %v2204_v56  ;;  %v2212_v10 = vmax.f32 %v2210_v38, %v2211_v21  ;;  %v2218_v39 = vrot.slane %v2217_v7, 4 }
 0x19f   : > { %v3738_v46 = vpop.eup %3005  ;;  %v980_v3 = vcombine.high %v972_v49, %v972_v49  ;;  %v981_v16 = vcombine.high %v979_v12, %v979_v12  ;;  %v1692_v54 = vsel %vm381_vm0, %v972_v49, -inf  ;;  %v1706_v36 = vsel %vm381_vm0, %v979_v12, -inf }
 0x1a0   : > { %v3742_v37 = vpop.eup %3007  ;;  %v2200_v22 = vmax.f32 %v2198_v24, %v2199_v29  ;;  %v2206_v51 = vrot.slane %v2205_v31, 2  ;;  %v2213_v53 = vrot.slane %v2212_v10, 2  ;;  %v2219_v52 = vmax.f32 %v2217_v7, %v2218_v39  ;;  %v3752_v24 = vpop.f32.mrb[15].mxu0 }
 0x1a1   : > { %v3744_v41 = vpop.eup %3009  ;;  %v1693_v19 = vrot.slane %v1692_v54, 4  ;;  %v1699_v6 = vsel %vm381_vm0, %v980_v3, -inf  ;;  %v1707_v18 = vrot.slane %v1706_v36, 4  ;;  %v1713_v2 = vsel %vm381_vm0, %v981_v16, -inf }
 0x1a2   : > { %v3748_v9 = vpop.eup %3011  ;;  %v2201_v0 = vrot.slane %v2200_v22, 1  ;;  %v2207_v40 = vmax.f32 %v2205_v31, %v2206_v51  ;;  %v2214_v62 = vmax.f32 %v2212_v10, %v2213_v53  ;;  %v2220_v44 = vrot.slane %v2219_v52, 2  ;;  %v4181_v10 = vld [vmem:[#allocation7_spill] sm:$0xff] }
 0x1a3   : > { %v1694_v1 = vmax.f32 %v1692_v54, %v1693_v19  ;;  %v1700_v59 = vrot.slane %v1699_v6, 4  ;;  %v1708_v5 = vmax.f32 %v1706_v36, %v1707_v18  ;;  %v1714_v47 = vrot.slane %v1713_v2, 4  ;;  %v4182_v19 = vld [vmem:[#allocation8_spill] sm:$0xff] }
 0x1a4   : > { %v3014_v27 = vpop.eup %3013  ;;  %v3750_v45 = vmax.f32 %v2200_v22, %v2201_v0  ;;  %v2208_v63 = vrot.slane %v2207_v40, 1  ;;  %v2215_v38 = vrot.slane %v2214_v62, 1  ;;  %v2221_v25 = vmax.f32 %v2219_v52, %v2220_v44 }
 0x1a5   : > { %v1695_v56 = vrot.slane %v1694_v1, 2  ;;  %v1701_v21 = vmax.f32 %v1699_v6, %v1700_v59  ;;  %v1709_v49 = vrot.slane %v1708_v5, 2  ;;  %v1715_v7 = vmax.f32 %v1713_v2, %v1714_v47  ;;  %v3765_v47 = vpop.f32.mrb[15].mxu1 }
 0x1a6   : > { %v3754_v12 = vmax.f32 %v2207_v40, %v2208_v63  ;;  %v3756_v29 = vmax.f32 %v2214_v62, %v2215_v38  ;;  %v2222_v31 = vrot.slane %v2221_v25, 1  ;;  %v837_v39 = vmul.f32 %v3014_v27, %v4181_v10 }
 0x1a7   : > { %v3016_v3 = vpop.eup %3015  ;;  %v1696_v16 = vmax.f32 %v1694_v1, %v1695_v56  ;;  %v1702_v54 = vrot.slane %v1701_v21, 2  ;;  %v1710_v36 = vmax.f32 %v1708_v5, %v1709_v49  ;;  %v1716_v22 = vrot.slane %v1715_v7, 2 }
 0x1a8   : > { %v3759_v51 = vmax.f32 %v2221_v25, %v2222_v31  ;;  %v1237_v53 = vcombine.high %v837_v39, %v837_v39  ;;  %v1244_v52 = vrot.slane %v837_v39, %v3350_v58  ;;  %v826_v6 = vmul.f32 %v3016_v3, %v4182_v19 }
 0x1a9   : > { %v1697_v18 = vrot.slane %v1696_v16, 1  ;;  %v1703_v2 = vmax.f32 %v1701_v21, %v1702_v54  ;;  %v1711_v0 = vrot.slane %v1710_v36, 1  ;;  %v1717_v40 = vmax.f32 %v1715_v7, %v1716_v22 }
 0x1aa   : > { %v1251_v62 = vrot.slane %v1237_v53, %v3350_v58  ;;  %v1252_v44 = vcombine.high %v1244_v52, %v1244_v52  ;;  %v2140_v59 = vsel %vm381_vm0, %v1244_v52, -inf  ;;  %v1050_v1 = vcombine.high %v826_v6, %v826_v6 }
 0x1ab   : > { %v1698_v5 = vmax.f32 %v1696_v16, %v1697_v18  ;;  %v1704_v27 = vrot.slane %v1703_v2, 1  ;;  %v1712_v63 = vmax.f32 %v1710_v36, %v1711_v0  ;;  %v1718_v38 = vrot.slane %v1717_v40, 1 }
 0x1ac   : > { %v1253_v25 = vcombine.high %v1251_v62, %v1251_v62  ;;  %v2141_v56 = vrot.slane %v2140_v59, 4  ;;  %v2147_v49 = vsel %vm381_vm0, %v1252_v44, -inf  ;;  %v2154_v21 = vsel %vm381_vm0, %v1251_v62, -inf }
 0x1ad   : > { %v1705_v31 = vmax.f32 %v1703_v2, %v1704_v27  ;;  %v1719_v7 = vmax.f32 %v1717_v40, %v1718_v38  ;;  %v2460_v10 = vmax.f32 %v1698_v5, %v3668_v34  ;;  %v2462_v39 = vmax.f32 %v1712_v63, %v3709_v30 }
 0x1ae   : > { %v2142_v3 = vmax.f32 %v2140_v59, %v2141_v56  ;;  %v2148_v54 = vrot.slane %v2147_v49, 4  ;;  %v2155_v22 = vrot.slane %v2154_v21, 4  ;;  %v2161_v16 = vsel %vm381_vm0, %v1253_v25, -inf }
 0x1af   : > { %v2461_v36 = vmax.f32 %v1705_v31, %v3687_v14  ;;  %v2463_v53 = vmax.f32 %v1719_v7, %v3711_v33  ;;  %v2593_v52 = vsel %vm2582_vm5, %v2460_v10, %v3649_v17  ;;  %v2162_v19 = vrot.slane %v2161_v16, 4 }
 0x1b0   : > { %v2143_v18 = vrot.slane %v2142_v3, 2  ;;  %v2149_v2 = vmax.f32 %v2147_v49, %v2148_v54  ;;  %v2156_v0 = vmax.f32 %v2154_v21, %v2155_v22  ;;  %v1057_v34 = vrot.slane %v826_v6, %v3350_v58 }
 0x1b1   : > { %v2594_v30 = vsel %vm2584_vm6, %v2461_v36, %v2593_v52  ;;  %v2163_v40 = vmax.f32 %v2161_v16, %v2162_v19  ;;  %v1064_v62 = vrot.slane %v1050_v1, %v3350_v58  ;;  %3017 = vrcp.f32 %v3736_v50 }
 0x1b2   : > { %v2595_v14 = vsel %vm2586_vm7, %v2462_v39, %v2594_v30  ;;  %v2144_v33 = vmax.f32 %v2142_v3, %v2143_v18  ;;  %v2150_v44 = vrot.slane %v2149_v2, 2  ;;  %v2157_v59 = vrot.slane %v2156_v0, 2 }
 0x1b3   : > { %v2596_v17 = vsel %vm2588_vm8, %v2463_v53, %v2595_v14  ;;  %v2164_v5 = vrot.slane %v2163_v40, 2  ;;  %v1065_v27 = vcombine.high %v1057_v34, %v1057_v34  ;;  %v1066_v63 = vcombine.high %v1064_v62, %v1064_v62 }
 0x1b4   : > { %2648 = vst [vmem:[%s3559_s27 + $0x8] sm:$0xff] %v2596_v17  ;;  %v2145_v38 = vrot.slane %v2144_v33, 1  ;;  %v2151_v6 = vmax.f32 %v2149_v2, %v2150_v44  ;;  %v2158_v25 = vmax.f32 %v2156_v0, %v2157_v59  ;;  %v1832_v56 = vsel %vm381_vm0, %v1057_v34, -inf }
 0x1b5   : > { %v2165_v49 = vmax.f32 %v2163_v40, %v2164_v5  ;;  %v1833_v1 = vrot.slane %v1832_v56, 4  ;;  %v1839_v50 = vsel %vm381_vm0, %v1065_v27, -inf  ;;  %v1846_v21 = vsel %vm381_vm0, %v1064_v62, -inf }
 0x1b6   : > { %v2146_v31 = vmax.f32 %v2144_v33, %v2145_v38  ;;  %v2152_v7 = vrot.slane %v2151_v6, 1  ;;  %v2159_v10 = vrot.slane %v2158_v25, 1  ;;  %v1840_v39 = vrot.slane %v1839_v50, 4 }
 0x1b7   : > { %v2166_v3 = vrot.slane %v2165_v49, 1  ;;  %v1834_v54 = vmax.f32 %v1832_v56, %v1833_v1  ;;  %v1847_v22 = vrot.slane %v1846_v21, 4  ;;  %v1853_v16 = vsel %vm381_vm0, %v1066_v63, -inf }
 0x1b8   : > { %v2153_v36 = vmax.f32 %v2151_v6, %v2152_v7  ;;  %v2160_v53 = vmax.f32 %v2158_v25, %v2159_v10  ;;  %v2492_v52 = vmax.f32 %v2146_v31, %v3750_v45  ;;  %v1841_v19 = vmax.f32 %v1839_v50, %v1840_v39 }
 0x1b9   : > { %v2167_v18 = vmax.f32 %v2165_v49, %v2166_v3  ;;  %v1835_v2 = vrot.slane %v1834_v54, 2  ;;  %v1848_v0 = vmax.f32 %v1846_v21, %v1847_v22  ;;  %v1854_v34 = vrot.slane %v1853_v16, 4 }
 0x1ba   : > { %v2493_v30 = vmax.f32 %v2153_v36, %v3754_v12  ;;  %v2494_v40 = vmax.f32 %v2160_v53, %v3756_v29  ;;  %v2621_v62 = vsel %vm2582_vm5, %v2492_v52, %v3653_v13  ;;  %v1842_v14 = vrot.slane %v1841_v19, 2 }
 0x1bb   : > { %v3018_v33 = vpop.eup %3017  ;;  %v2495_v44 = vmax.f32 %v2167_v18, %v3759_v51  ;;  %v1836_v59 = vmax.f32 %v1834_v54, %v1835_v2  ;;  %v1849_v17 = vrot.slane %v1848_v0, 2  ;;  %v1855_v45 = vmax.f32 %v1853_v16, %v1854_v34 }
 0x1bc   : > { %v2622_v5 = vsel %vm2584_vm6, %v2493_v30, %v2621_v62  ;;  %v1843_v27 = vmax.f32 %v1841_v19, %v1842_v14  ;;  %v842_v63 = vmul.f32 %v3018_v33, %v3367_v20  ;;  %v728_v12 = vadd.f32 1.0, %v3738_v46 }
 0x1bd   : > { %v2623_v29 = vsel %vm2586_vm7, %v2494_v40, %v2622_v5  ;;  %v1837_v38 = vrot.slane %v1836_v59, 1  ;;  %v1850_v6 = vmax.f32 %v1848_v0, %v1849_v17  ;;  %v1856_v13 = vrot.slane %v1855_v45, 2 }
 0x1be   : > { %v2624_v25 = vsel %vm2588_vm8, %v2495_v44, %v2623_v29  ;;  %v1844_v56 = vrot.slane %v1843_v27, 1  ;;  %v1322_v51 = vcombine.high %v842_v63, %v842_v63  ;;  %v1329_v49 = vrot.slane %v842_v63, %v3350_v58 }
 0x1bf   : > { %2652 = vst [vmem:[%s3559_s27 + $0x28] sm:$0xff] %v2624_v25  ;;  %v1851_v1 = vrot.slane %v1850_v6, 1  ;;  %3019 = vrcp.f32 %v728_v12  ;;  %v3801_v50 = vmul.f32 -1.442695, %v3722_v60  ;;  %v3805_v20 = vadd.f32 %v3673_v15, %v3729_v57 }
 0x1c0   : > { %v1857_v46 = vmax.f32 %v1855_v45, %v1856_v13  ;;  %v1336_v21 = vrot.slane %v1322_v51, %v3350_v58  ;;  %v1337_v31 = vcombine.high %v1329_v49, %v1329_v49  ;;  %v2280_v7 = vsel %vm381_vm0, %v1329_v49, -inf }
 0x1c1   : > { %v3809_v10 = vmax.f32 %v1836_v59, %v1837_v38  ;;  %v3811_v39 = vmax.f32 %v1843_v27, %v1844_v56  ;;  %v2281_v3 = vrot.slane %v2280_v7, 4  ;;  %v744_v54 = vadd.f32 1.0, %v3742_v37 }
 0x1c2   : > { %v1338_v22 = vcombine.high %v1336_v21, %v1336_v21  ;;  %v2287_v16 = vsel %vm381_vm0, %v1337_v31, -inf  ;;  %v2294_v36 = vsel %vm381_vm0, %v1336_v21, -inf  ;;  %v731_v57 = vadd.f32 1.0, %v3744_v41 }
 0x1c3   : > { %v3817_v53 = vmax.f32 %v1850_v6, %v1851_v1  ;;  %v2282_v52 = vmax.f32 %v2280_v7, %v2281_v3  ;;  %v2288_v19 = vrot.slane %v2287_v16, 4  ;;  %v2295_v18 = vrot.slane %v2294_v36, 4 }
 0x1c4   : > { %v1858_v2 = vrot.slane %v1857_v46, 1  ;;  %v2301_v0 = vsel %vm381_vm0, %v1338_v22, -inf  ;;  %3021 = vrcp.f32 %v744_v54  ;;  %v747_v34 = vadd.f32 1.0, %v3748_v9 }
 0x1c5   : > { %v2283_v30 = vrot.slane %v2282_v52, 2  ;;  %v2289_v37 = vmax.f32 %v2287_v16, %v2288_v19  ;;  %v2296_v40 = vmax.f32 %v2294_v36, %v2295_v18  ;;  %v2302_v62 = vrot.slane %v2301_v0, 4 }
 0x1c6   : > { %3023 = vrcp.f32 %v731_v57  ;;  %v565_v14 = vmul.f32 %v3660_v26, %v3608_v48  ;;  %v581_v41 = vmul.f32 %v3660_v26, %v3623_v43  ;;  %v568_v33 = vmul.f32 %v3660_v26, %v3638_v4 }
 0x1c7   : > { %v2284_v44 = vmax.f32 %v2282_v52, %v2283_v30  ;;  %v2290_v59 = vrot.slane %v2289_v37, 2  ;;  %v2297_v17 = vrot.slane %v2296_v40, 2  ;;  %v2303_v45 = vmax.f32 %v2301_v0, %v2302_v62 }
 0x1c8   : > { %3025 = vrcp.f32 %v747_v34  ;;  %v3828_v9 = vadd.f32 %v3673_v15, %v565_v14  ;;  %v3831_v5 = vadd.f32 %v3673_v15, %v581_v41  ;;  %v3834_v27 = vadd.f32 %v3673_v15, %v568_v33 }
 0x1c9   : > { %v3020_v48 = vpop.eup %3019  ;;  %v2285_v63 = vrot.slane %v2284_v44, 1  ;;  %v2291_v43 = vmax.f32 %v2289_v37, %v2290_v59  ;;  %v2298_v12 = vmax.f32 %v2296_v40, %v2297_v17  ;;  %v2304_v29 = vrot.slane %v2303_v45, 2 }
 0x1ca   : > { %v3836_v4 = vmax.f32 %v1857_v46, %v1858_v2  ;;  %v824_v38 = vmul.f32 %v3020_v48, %v3676_v23  ;;  %3027 = vpow2.f32 %v3716_v55  ;;  %v2805_v6 = vmul.f32 -1.442695, %v3805_v20 }
 0x1cb   : > { %v2292_v13 = vrot.slane %v2291_v43, 1  ;;  %v2299_v25 = vrot.slane %v2298_v12, 1  ;;  %v2305_v56 = vmax.f32 %v2303_v45, %v2304_v29  ;;  %v2787_v51 = vmul.f32 -1.442695, %v3828_v9 }
 0x1cc   : > { %v3842_v49 = vmax.f32 %v2284_v44, %v2285_v63  ;;  %v1016_v1 = vcombine.high %v824_v38, %v824_v38  ;;  %v1023_v21 = vrot.slane %v824_v38, %v3350_v58  ;;  %v3846_v31 = vmul.f32 -1.442695, %v3831_v5 }
 0x1cd   : > { %v3848_v46 = vmax.f32 %v2291_v43, %v2292_v13  ;;  %v2306_v23 = vrot.slane %v2305_v56, 1  ;;  %3029 = vpow2.f32 %v3719_v11  ;;  %v3852_v55 = vmul.f32 -1.442695, %v3834_v27 }
 0x1ce   : > { %v3022_v7 = vpop.eup %3021  ;;  %v1030_v3 = vrot.slane %v1016_v1, %v3350_v58  ;;  %v1031_v54 = vcombine.high %v1023_v21, %v1023_v21  ;;  %v1776_v22 = vsel %vm381_vm0, %v1023_v21, -inf  ;;  %3031 = vpow2.f32 %v3801_v50 }
 0x1cf   : > { %v3857_v16 = vmax.f32 %v2298_v12, %v2299_v25  ;;  %v1777_v36 = vrot.slane %v1776_v22, 4  ;;  %v840_v57 = vmul.f32 %v3022_v7, %v3681_v61  ;;  %3033 = vpow2.f32 %v2805_v6 }
 0x1d0   : > { %v3024_v52 = vpop.eup %3023  ;;  %v3860_v19 = vmax.f32 %v2305_v56, %v2306_v23  ;;  %v1032_v11 = vcombine.high %v1030_v3, %v1030_v3  ;;  %v1783_v18 = vsel %vm381_vm0, %v1031_v54, -inf  ;;  %v1790_v2 = vsel %vm381_vm0, %v1030_v3, -inf }
 0x1d1   : > { %v1778_v0 = vmax.f32 %v1776_v22, %v1777_v36  ;;  %v1784_v34 = vrot.slane %v1783_v18, 4  ;;  %v1791_v30 = vrot.slane %v1790_v2, 4  ;;  %v1288_v37 = vcombine.high %v840_v57, %v840_v57 }
 0x1d2   : > { %v3864_v40 = vpop.eup %3025  ;;  %v1797_v50 = vsel %vm381_vm0, %v1032_v11, -inf  ;;  %v1295_v62 = vrot.slane %v840_v57, %v3350_v58  ;;  %v827_v61 = vmul.f32 %v3024_v52, %v3691_v35  ;;  %3035 = vpow2.f32 %v2787_v51 }
 0x1d3   : > { %v1779_v14 = vrot.slane %v1778_v0, 2  ;;  %v1785_v41 = vmax.f32 %v1783_v18, %v1784_v34  ;;  %v1792_v33 = vmax.f32 %v1790_v2, %v1791_v30  ;;  %v1798_v44 = vrot.slane %v1797_v50, 4 }
 0x1d4   : > { %v3869_v59 = vpop.eup %3027  ;;  %v1302_v17 = vrot.slane %v1288_v37, %v3350_v58  ;;  %v1303_v45 = vcombine.high %v1295_v62, %v1295_v62  ;;  %v2224_v48 = vsel %vm381_vm0, %v1295_v62, -inf  ;;  %v1067_v63 = vcombine.high %v827_v61, %v827_v61 }
 0x1d5   : > { %v1780_v43 = vmax.f32 %v1778_v0, %v1779_v14  ;;  %v1786_v12 = vrot.slane %v1785_v41, 2  ;;  %v1793_v29 = vrot.slane %v1792_v33, 2  ;;  %v1799_v38 = vmax.f32 %v1797_v50, %v1798_v44 }
 0x1d6   : > { %v1304_v6 = vcombine.high %v1302_v17, %v1302_v17  ;;  %v2225_v13 = vrot.slane %v2224_v48, 4  ;;  %v2231_v35 = vsel %vm381_vm0, %v1303_v45, -inf  ;;  %v2238_v25 = vsel %vm381_vm0, %v1302_v17, -inf }
 0x1d7   : > { %v3875_v56 = vpop.eup %3029  ;;  %v1781_v51 = vrot.slane %v1780_v43, 1  ;;  %v1787_v1 = vmax.f32 %v1785_v41, %v1786_v12  ;;  %v1794_v21 = vmax.f32 %v1792_v33, %v1793_v29  ;;  %v1800_v23 = vrot.slane %v1799_v38, 2 }
 0x1d8   : > { %v3877_v7 = vpop.eup %3031  ;;  %v2226_v3 = vmax.f32 %v2224_v48, %v2225_v13  ;;  %v2232_v54 = vrot.slane %v2231_v35, 4  ;;  %v2239_v22 = vrot.slane %v2238_v25, 4  ;;  %v2245_v36 = vsel %vm381_vm0, %v1304_v6, -inf }
 0x1d9   : > { %v3880_v57 = vpop.eup %3033  ;;  %v1782_v52 = vmax.f32 %v1780_v43, %v1781_v51  ;;  %v1788_v11 = vrot.slane %v1787_v1, 1  ;;  %v1795_v18 = vrot.slane %v1794_v21, 1  ;;  %v1801_v2 = vmax.f32 %v1799_v38, %v1800_v23 }
 0x1da   : > { %v2227_v0 = vrot.slane %v2226_v3, 2  ;;  %v2233_v34 = vmax.f32 %v2231_v35, %v2232_v54  ;;  %v2240_v30 = vmax.f32 %v2238_v25, %v2239_v22  ;;  %v2246_v37 = vrot.slane %v2245_v36, 4 }
 0x1db   : > { %v1789_v50 = vmax.f32 %v1787_v1, %v1788_v11  ;;  %v1796_v62 = vmax.f32 %v1794_v21, %v1795_v18  ;;  %v1802_v14 = vrot.slane %v1801_v2, 1  ;;  %v2464_v41 = vmax.f32 %v1782_v52, %v3809_v10 }
 0x1dc   : > { %v3883_v33 = vpop.eup %3035  ;;  %v2228_v44 = vmax.f32 %v2226_v3, %v2227_v0  ;;  %v2234_v17 = vrot.slane %v2233_v34, 2  ;;  %v2241_v45 = vrot.slane %v2240_v30, 2  ;;  %v2247_v48 = vmax.f32 %v2245_v36, %v2246_v37 }
 0x1dd   : > { %v1803_v12 = vmax.f32 %v1801_v2, %v1802_v14  ;;  %v2465_v43 = vmax.f32 %v1789_v50, %v3811_v39  ;;  %v2466_v29 = vmax.f32 %v1796_v62, %v3817_v53  ;;  %v1074_v38 = vrot.slane %v827_v61, %v3350_v58 }
 0x1de   : > { %v2229_v6 = vrot.slane %v2228_v44, 1  ;;  %v2235_v13 = vmax.f32 %v2233_v34, %v2234_v17  ;;  %v2242_v35 = vmax.f32 %v2240_v30, %v2241_v45  ;;  %v2248_v25 = vrot.slane %v2247_v48, 2 }
 0x1df   : > { %v2467_v51 = vmax.f32 %v1803_v12, %v3836_v4  ;;  %v2597_v10 = vsel %vm2576_vm2, %v2465_v43, %v2464_v41  ;;  %v1081_v1 = vrot.slane %v1067_v63, %v3350_v58  ;;  %v1082_v21 = vcombine.high %v1074_v38, %v1074_v38 }
 0x1e0   : > { %v2598_v23 = vsel %vm2578_vm3, %v2466_v29, %v2597_v10  ;;  %v2230_v3 = vmax.f32 %v2228_v44, %v2229_v6  ;;  %v2236_v54 = vrot.slane %v2235_v13, 1  ;;  %v2243_v39 = vrot.slane %v2242_v35, 1 }
 0x1e1   : > { %v2249_v22 = vmax.f32 %v2247_v48, %v2248_v25  ;;  %v1083_v53 = vcombine.high %v1081_v1, %v1081_v1  ;;  %v1860_v61 = vsel %vm381_vm0, %v1074_v38, -inf  ;;  %v1867_v36 = vsel %vm381_vm0, %v1082_v21, -inf }
 0x1e2   : > { %v2237_v52 = vmax.f32 %v2235_v13, %v2236_v54  ;;  %v2244_v11 = vmax.f32 %v2242_v35, %v2243_v39  ;;  %v2496_v4 = vmax.f32 %v2230_v3, %v3842_v49  ;;  %v1861_v18 = vrot.slane %v1860_v61, 4 }
 0x1e3   : > { %v2250_v2 = vrot.slane %v2249_v22, 1  ;;  %v1868_v0 = vrot.slane %v1867_v36, 4  ;;  %v1874_v63 = vsel %vm381_vm0, %v1081_v1, -inf  ;;  %v1881_v34 = vsel %vm381_vm0, %v1083_v53, -inf }
 0x1e4   : > { %v2497_v30 = vmax.f32 %v2237_v52, %v3848_v46  ;;  %v2498_v37 = vmax.f32 %v2244_v11, %v3857_v16  ;;  %v1862_v50 = vmax.f32 %v1860_v61, %v1861_v18  ;;  %v1875_v62 = vrot.slane %v1874_v63, 4 }
 0x1e5   : > { %v2251_v14 = vmax.f32 %v2249_v22, %v2250_v2  ;;  %v1869_v41 = vmax.f32 %v1867_v36, %v1868_v0  ;;  %v1882_v44 = vrot.slane %v1881_v34, 4  ;;  %v843_v17 = vmul.f32 %v3864_v40, %v3697_v28 }
 0x1e6   : > { %v2625_v49 = vsel %vm2576_vm2, %v2497_v30, %v2496_v4  ;;  %v1863_v45 = vrot.slane %v1862_v50, 2  ;;  %v1876_v48 = vmax.f32 %v1874_v63, %v1875_v62  ;;  %v729_v12 = vadd.f32 1.0, %v3869_v59 }
 0x1e7   : > { %v2499_v43 = vmax.f32 %v2251_v14, %v3860_v19  ;;  %v2626_v46 = vsel %vm2578_vm3, %v2498_v37, %v2625_v49  ;;  %v1870_v29 = vrot.slane %v1869_v41, 2  ;;  %v1883_v16 = vmax.f32 %v1881_v34, %v1882_v44 }
 0x1e8   : > { %v1864_v38 = vmax.f32 %v1862_v50, %v1863_v45  ;;  %v1339_v6 = vcombine.high %v843_v17, %v843_v17  ;;  %v1346_v13 = vrot.slane %v843_v17, %v3350_v58  ;;  %3037 = vpow2.f32 %v3846_v31 }
 0x1e9   : > { %v1877_v35 = vrot.slane %v1876_v48, 2  ;;  %v1884_v28 = vrot.slane %v1883_v16, 2  ;;  %3039 = vrcp.f32 %v729_v12  ;;  %v3908_v40 = vsel %vm2580_vm4, %v2467_v51, %v2598_v23 }
 0x1ea   : > { %v1353_v59 = vrot.slane %v1339_v6, %v3350_v58  ;;  %v1354_v25 = vcombine.high %v1346_v13, %v1346_v13  ;;  %3041 = vpow2.f32 %v3852_v55  ;;  %v1871_v19 = vmax.f32 %v1869_v41, %v1870_v29 }
 0x1eb   : > { %v2308_v10 = vsel %vm381_vm0, %v1346_v13, -inf  ;;  %v745_v1 = vadd.f32 1.0, %v3875_v56  ;;  %v1865_v21 = vrot.slane %v1864_v38, 1  ;;  %v1878_v31 = vmax.f32 %v1876_v48, %v1877_v35 }
 0x1ec   : > { %v1355_v3 = vcombine.high %v1353_v59, %v1353_v59  ;;  %v2309_v54 = vrot.slane %v2308_v10, 4  ;;  %v1885_v39 = vmax.f32 %v1883_v16, %v1884_v28  ;;  %v2315_v22 = vsel %vm381_vm0, %v1354_v25, -inf }
 0x1ed   : > { %v2322_v51 = vsel %vm381_vm0, %v1353_v59, -inf  ;;  %v2316_v53 = vrot.slane %v2315_v22, 4  ;;  %v1872_v36 = vrot.slane %v1871_v19, 1  ;;  %3043 = vrcp.f32 %v745_v1 }
 0x1ee   : > { %v2310_v23 = vmax.f32 %v2308_v10, %v2309_v54  ;;  %v2323_v61 = vrot.slane %v2322_v51, 4  ;;  %v2329_v55 = vsel %vm381_vm0, %v1355_v3, -inf  ;;  %v3918_v52 = vsel %vm2580_vm4, %v2499_v43, %v2626_v46 }
 0x1ef   : > { %v2317_v11 = vmax.f32 %v2315_v22, %v2316_v53  ;;  %v2330_v18 = vrot.slane %v2329_v55, 4  ;;  %v3920_v2 = vmax.f32 %v1864_v38, %v1865_v21  ;;  %v1879_v0 = vrot.slane %v1878_v31, 1 }
 0x1f0   : > { %v2311_v56 = vrot.slane %v2310_v23, 2  ;;  %v2324_v4 = vmax.f32 %v2322_v51, %v2323_v61  ;;  %v1886_v63 = vrot.slane %v1885_v39, 1  ;;  %v734_v34 = vadd.f32 1.0, %v3877_v7 }
 0x1f1   : > { %v2318_v50 = vrot.slane %v2317_v11, 2  ;;  %v2331_v14 = vmax.f32 %v2329_v55, %v2330_v18  ;;  %v750_v44 = vadd.f32 1.0, %v3880_v57  ;;  %v584_v17 = vmul.f32 %v3660_v26, %v3664_v42 }
 0x1f2   : > { %v3038_v30 = vpop.eup %3037  ;;  %v2312_v37 = vmax.f32 %v2310_v23, %v2311_v56  ;;  %v2325_v62 = vrot.slane %v2324_v4, 2  ;;  %3045 = vrcp.f32 %v734_v34  ;;  %v566_v49 = vmul.f32 %v3660_v26, %v3752_v24 }
 0x1f3   : > { %v3040_v41 = vpop.eup %3039  ;;  %v2319_v12 = vmax.f32 %v2317_v11, %v2318_v50  ;;  %v2332_v7 = vrot.slane %v2331_v14, 2  ;;  %v3928_v46 = vmax.f32 %v1871_v19, %v1872_v36  ;;  %v3930_v29 = vmax.f32 %v1878_v31, %v1879_v0 }
 0x1f4   : > { %v3042_v45 = vpop.eup %3041  ;;  %v2313_v48 = vrot.slane %v2312_v37, 1  ;;  %v2326_v43 = vmax.f32 %v2324_v4, %v2325_v62  ;;  %v3932_v16 = vmax.f32 %v1885_v39, %v1886_v63  ;;  %v825_v38 = vmul.f32 %v3040_v41, %v3700_v8 }
 0x1f5   : > { %v2320_v57 = vrot.slane %v2319_v12, 1  ;;  %v2333_v6 = vmax.f32 %v2331_v14, %v2332_v7  ;;  %v732_v42 = vadd.f32 1.0, %v3883_v33  ;;  %v748_v13 = vadd.f32 1.0, %v3038_v30 }
 0x1f6   : > { %v2327_v35 = vrot.slane %v2326_v43, 1  ;;  %v1033_v26 = vcombine.high %v825_v38, %v825_v38  ;;  %v1040_v24 = vrot.slane %v825_v38, %v3350_v58  ;;  %v3937_v28 = vadd.f32 1.0, %v3042_v45 }
 0x1f7   : > { %v3939_v59 = vmax.f32 %v2312_v37, %v2313_v48  ;;  %3047 = vrcp.f32 %v750_v44  ;;  %v3942_v25 = vadd.f32 %v3673_v15, %v584_v17  ;;  %v3945_v19 = vadd.f32 %v3673_v15, %v566_v49  ;;  %v3044_v8 = vpop.eup %3043 }
 0x1f8   : > { %v2334_v10 = vrot.slane %v2333_v6, 1  ;;  %v1047_v33 = vrot.slane %v1033_v26, %v3350_v58  ;;  %v1048_v1 = vcombine.high %v1040_v24, %v1040_v24  ;;  %v1804_v21 = vsel %vm381_vm0, %v1040_v24, -inf }
 0x1f9   : > { %v3949_v3 = vmax.f32 %v2319_v12, %v2320_v57  ;;  %v1805_v54 = vrot.slane %v1804_v21, 4  ;;  %v841_v31 = vmul.f32 %v3044_v8, %v3707_v32  ;;  %3049 = vrcp.f32 %v732_v42 }
 0x1fa   : > { %v3952_v39 = vmax.f32 %v2326_v43, %v2327_v35  ;;  %v1049_v22 = vcombine.high %v1047_v33, %v1047_v33  ;;  %v1811_v51 = vsel %vm381_vm0, %v1048_v1, -inf  ;;  %v1818_v15 = vsel %vm381_vm0, %v1047_v33, -inf }
 0x1fb   : > { %v1806_v23 = vmax.f32 %v1804_v21, %v1805_v54  ;;  %v1812_v53 = vrot.slane %v1811_v51, 4  ;;  %v1819_v61 = vrot.slane %v1818_v15, 4  ;;  %v1305_v36 = vcombine.high %v841_v31, %v841_v31 }
 0x1fc   : > { %v3046_v55 = vpop.eup %3045  ;;  %v3956_v56 = vmax.f32 %v2333_v6, %v2334_v10  ;;  %v1825_v11 = vsel %vm381_vm0, %v1049_v22, -inf  ;;  %v1312_v4 = vrot.slane %v841_v31, %v3350_v58  ;;  %3051 = vrcp.f32 %v748_v13 }
 0x1fd   : > { %v1807_v32 = vrot.slane %v1806_v23, 2  ;;  %v1813_v18 = vmax.f32 %v1811_v51, %v1812_v53  ;;  %v1820_v0 = vmax.f32 %v1818_v15, %v1819_v61  ;;  %v1826_v63 = vrot.slane %v1825_v11, 4 }
 0x1fe   : > { %v1319_v34 = vrot.slane %v1305_v36, %v3350_v58  ;;  %v1320_v30 = vcombine.high %v1312_v4, %v1312_v4  ;;  %v2252_v37 = vsel %vm381_vm0, %v1312_v4, -inf  ;;  %v830_v50 = vmul.f32 %v3046_v55, %v3722_v60 }
 0x1ff   : > { %v1808_v62 = vmax.f32 %v1806_v23, %v1807_v32  ;;  %v1814_v14 = vrot.slane %v1813_v18, 2  ;;  %v1821_v41 = vrot.slane %v1820_v0, 2  ;;  %v1827_v44 = vmax.f32 %v1825_v11, %v1826_v63 }
 0x200   : > { %v1321_v17 = vcombine.high %v1319_v34, %v1319_v34  ;;  %v2253_v49 = vrot.slane %v2252_v37, 4  ;;  %v2259_v45 = vsel %vm381_vm0, %v1320_v30, -inf  ;;  %v2266_v48 = vsel %vm381_vm0, %v1319_v34, -inf }
 0x201   : > { %v3965_v12 = vpop.eup %3047  ;;  %v1809_v43 = vrot.slane %v1808_v62, 1  ;;  %v1815_v7 = vmax.f32 %v1813_v18, %v1814_v14  ;;  %v1822_v38 = vmax.f32 %v1820_v0, %v1821_v41  ;;  %v1828_v57 = vrot.slane %v1827_v44, 2 }
 0x202   : > { %v2254_v6 = vmax.f32 %v2252_v37, %v2253_v49  ;;  %v2260_v42 = vrot.slane %v2259_v45, 4  ;;  %v2267_v13 = vrot.slane %v2266_v48, 4  ;;  %v2273_v60 = vsel %vm381_vm0, %v1321_v17, -inf }
 0x203   : > { %v3968_v35 = vpop.eup %3049  ;;  %v1810_v26 = vmax.f32 %v1808_v62, %v1809_v43  ;;  %v1816_v24 = vrot.slane %v1815_v7, 1  ;;  %v1823_v8 = vrot.slane %v1822_v38, 1  ;;  %v1829_v10 = vmax.f32 %v1827_v44, %v1828_v57 }
 0x204   : > { %v2255_v33 = vrot.slane %v2254_v6, 2  ;;  %v2261_v1 = vmax.f32 %v2259_v45, %v2260_v42  ;;  %v2268_v21 = vmax.f32 %v2266_v48, %v2267_v13  ;;  %v2274_v54 = vrot.slane %v2273_v60, 4 }
 0x205   : > { %v1817_v31 = vmax.f32 %v1815_v7, %v1816_v24  ;;  %v1824_v22 = vmax.f32 %v1822_v38, %v1823_v8  ;;  %v1830_v51 = vrot.slane %v1829_v10, 1  ;;  %v2468_v15 = vmax.f32 %v1810_v26, %v3920_v2 }
 0x206   : > { %v3971_v23 = vpop.eup %3051  ;;  %v2256_v53 = vmax.f32 %v2254_v6, %v2255_v33  ;;  %v2262_v61 = vrot.slane %v2261_v1, 2  ;;  %v2269_v36 = vrot.slane %v2268_v21, 2  ;;  %v2275_v55 = vmax.f32 %v2273_v60, %v2274_v54 }
 0x207   : > { %v1831_v11 = vmax.f32 %v1829_v10, %v1830_v51  ;;  %v2469_v4 = vmax.f32 %v1817_v31, %v3928_v46  ;;  %v2470_v32 = vmax.f32 %v1824_v22, %v3930_v29  ;;  %v2600_v18 = vsel %vm2582_vm5, %v2468_v15, %v3908_v40 }
 0x208   : > { %v2257_v0 = vrot.slane %v2256_v53, 1  ;;  %v2263_v63 = vmax.f32 %v2261_v1, %v2262_v61  ;;  %v2270_v34 = vmax.f32 %v2268_v21, %v2269_v36  ;;  %v2276_v30 = vrot.slane %v2275_v55, 2 }
 0x209   : > { %v2471_v2 = vmax.f32 %v1831_v11, %v3932_v16  ;;  %v2601_v37 = vsel %vm2584_vm6, %v2469_v4, %v2600_v18  ;;  %v1118_v62 = vcombine.high %v830_v50, %v830_v50  ;;  %v1125_v14 = vrot.slane %v830_v50, %v3350_v58 }
 0x20a   : > { %v2602_v41 = vsel %vm2586_vm7, %v2470_v32, %v2601_v37  ;;  %v2258_v46 = vmax.f32 %v2256_v53, %v2257_v0  ;;  %v2264_v44 = vrot.slane %v2263_v63, 1  ;;  %v2271_v29 = vrot.slane %v2270_v34, 1 }
 0x20b   : > { %v2603_v17 = vsel %vm2588_vm8, %v2471_v2, %v2602_v41  ;;  %v2277_v40 = vmax.f32 %v2275_v55, %v2276_v30  ;;  %v1132_v49 = vrot.slane %v1118_v62, %v3350_v58  ;;  %v1133_v45 = vcombine.high %v1125_v14, %v1125_v14 }
 0x20c   : > { %2649 = vst [vmem:[%s3559_s27 + $0x10] sm:$0xff] %v2603_v17  ;;  %v2265_v48 = vmax.f32 %v2263_v63, %v2264_v44  ;;  %v2272_v43 = vmax.f32 %v2270_v34, %v2271_v29  ;;  %v2500_v16 = vmax.f32 %v2258_v46, %v3939_v59  ;;  %v1944_v7 = vsel %vm381_vm0, %v1125_v14, -inf }
 0x20d   : > { %v2278_v38 = vrot.slane %v2277_v40, 1  ;;  %v1134_v50 = vcombine.high %v1132_v49, %v1132_v49  ;;  %v1945_v57 = vrot.slane %v1944_v7, 4  ;;  %v1951_v6 = vsel %vm381_vm0, %v1133_v45, -inf }
 0x20e   : > { %v2501_v42 = vmax.f32 %v2265_v48, %v3949_v3  ;;  %v2502_v13 = vmax.f32 %v2272_v43, %v3952_v39  ;;  %v2628_v60 = vsel %vm2582_vm5, %v2500_v16, %v3918_v52  ;;  %v1952_v26 = vrot.slane %v1951_v6, 4 }
 0x20f   : > { %v2279_v24 = vmax.f32 %v2277_v40, %v2278_v38  ;;  %v1946_v8 = vmax.f32 %v1944_v7, %v1945_v57  ;;  %v1958_v10 = vsel %vm381_vm0, %v1132_v49, -inf  ;;  %v1965_v59 = vsel %vm381_vm0, %v1134_v50, -inf }
 0x210   : > { %v2629_v33 = vsel %vm2584_vm6, %v2501_v42, %v2628_v60  ;;  %v1953_v1 = vmax.f32 %v1951_v6, %v1952_v26  ;;  %v1959_v21 = vrot.slane %v1958_v10, 4  ;;  %v1966_v54 = vrot.slane %v1965_v59, 4 }
 0x211   : > { %v2503_v3 = vmax.f32 %v2279_v24, %v3956_v56  ;;  %v2630_v39 = vsel %vm2586_vm7, %v2502_v13, %v2629_v33  ;;  %v1947_v31 = vrot.slane %v1946_v8, 2  ;;  %v846_v52 = vmul.f32 %v3965_v12, %v3805_v20 }
 0x212   : > { %v1954_v22 = vrot.slane %v1953_v1, 2  ;;  %v1960_v51 = vmax.f32 %v1958_v10, %v1959_v21  ;;  %v1967_v15 = vmax.f32 %v1965_v59, %v1966_v54  ;;  %v2806_v53 = vmul.f32 -1.442695, %v3942_v25 }
 0x213   : > { %v2631_v61 = vsel %vm2588_vm8, %v2503_v3, %v2630_v39  ;;  %v1390_v36 = vcombine.high %v846_v52, %v846_v52  ;;  %v1397_v55 = vrot.slane %v846_v52, %v3350_v58  ;;  %v828_v11 = vmul.f32 %v3968_v35, %v3828_v9 }
 0x214   : > { %2653 = vst [vmem:[%s3559_s27 + $0x30] sm:$0xff] %v2631_v61  ;;  %v1948_v56 = vmax.f32 %v1946_v8, %v1947_v31  ;;  %v1961_v4 = vrot.slane %v1960_v51, 2  ;;  %v2788_v32 = vmul.f32 -1.442695, %v3945_v19  ;;  %3053 = vrcp.f32 %v3937_v28 }
 0x215   : > { %v1404_v20 = vrot.slane %v1390_v36, %v3350_v58  ;;  %v1405_v12 = vcombine.high %v1397_v55, %v1397_v55  ;;  %v2392_v18 = vsel %vm381_vm0, %v1397_v55, -inf  ;;  %v1955_v0 = vmax.f32 %v1953_v1, %v1954_v22 }
 0x216   : > { %v1968_v63 = vrot.slane %v1967_v15, 2  ;;  %v2393_v34 = vrot.slane %v2392_v18, 4  ;;  %3055 = vpow2.f32 %v2806_v53  ;;  %v1084_v35 = vcombine.high %v828_v11, %v828_v11 }
 0x217   : > { %v1406_v30 = vcombine.high %v1404_v20, %v1404_v20  ;;  %v2399_v2 = vsel %vm381_vm0, %v1405_v12, -inf  ;;  %v2406_v9 = vsel %vm381_vm0, %v1404_v20, -inf  ;;  %v1949_v37 = vrot.slane %v1948_v56, 1 }
 0x218   : > { %v1962_v62 = vmax.f32 %v1960_v51, %v1961_v4  ;;  %v2394_v14 = vmax.f32 %v2392_v18, %v2393_v34  ;;  %3057 = vpow2.f32 %v2788_v32  ;;  %v2400_v41 = vrot.slane %v2399_v2, 4 }
 0x219   : > { %v2407_v46 = vrot.slane %v2406_v9, 4  ;;  %v2413_v44 = vsel %vm381_vm0, %v1406_v30, -inf  ;;  %v1091_v28 = vrot.slane %v828_v11, %v3350_v58  ;;  %v1956_v29 = vrot.slane %v1955_v0, 1 }
 0x21a   : > { %v1969_v17 = vmax.f32 %v1967_v15, %v1968_v63  ;;  %v2395_v40 = vrot.slane %v2394_v14, 2  ;;  %v2414_v49 = vrot.slane %v2413_v44, 4  ;;  %v2401_v45 = vmax.f32 %v2399_v2, %v2400_v41 }
 0x21b   : > { %v2408_v48 = vmax.f32 %v2406_v9, %v2407_v46  ;;  %v1098_v43 = vrot.slane %v1084_v35, %v3350_v58  ;;  %v1099_v16 = vcombine.high %v1091_v28, %v1091_v28  ;;  %v4013_v7 = vmax.f32 %v1948_v56, %v1949_v37 }
 0x21c   : > { %v1963_v38 = vrot.slane %v1962_v62, 1  ;;  %v2415_v50 = vmax.f32 %v2413_v44, %v2414_v49  ;;  %v1888_v57 = vsel %vm381_vm0, %v1091_v28, -inf  ;;  %v2402_v6 = vrot.slane %v2401_v45, 2 }
 0x21d   : > { %v2409_v42 = vrot.slane %v2408_v48, 2  ;;  %v1100_v13 = vcombine.high %v1098_v43, %v1098_v43  ;;  %v1889_v60 = vrot.slane %v1888_v57, 4  ;;  %v1970_v26 = vrot.slane %v1969_v17, 1 }
 0x21e   : > { %v1895_v24 = vsel %vm381_vm0, %v1099_v16, -inf  ;;  %v1902_v8 = vsel %vm381_vm0, %v1098_v43, -inf  ;;  %v844_v10 = vmul.f32 %v3971_v23, %v3831_v5  ;;  %v4020_v59 = vpop.eup %3053  ;;  %v4022_v33 = vmax.f32 %v2394_v14, %v2395_v40 }
 0x21f   : > { %v2416_v1 = vrot.slane %v2415_v50, 2  ;;  %v1890_v21 = vmax.f32 %v1888_v57, %v1889_v60  ;;  %v1896_v54 = vrot.slane %v1895_v24, 4  ;;  %v1957_v39 = vmax.f32 %v1955_v0, %v1956_v29 }
 0x220   : > { %v4024_v3 = vpop.eup %3055  ;;  %v4026_v31 = vmax.f32 %v2401_v45, %v2402_v6  ;;  %v1903_v52 = vrot.slane %v1902_v8, 4  ;;  %v1909_v22 = vsel %vm381_vm0, %v1100_v13, -inf  ;;  %v1964_v51 = vmax.f32 %v1962_v62, %v1963_v38 }
 0x221   : > { %v4029_v15 = vmax.f32 %v2408_v48, %v2409_v42  ;;  %v1891_v53 = vrot.slane %v1890_v21, 2  ;;  %v1897_v5 = vmax.f32 %v1895_v24, %v1896_v54  ;;  %v4033_v61 = vmax.f32 %v1969_v17, %v1970_v26 }
 0x222   : > { %v4031_v23 = vpop.eup %3057  ;;  %v1904_v36 = vmax.f32 %v1902_v8, %v1903_v52  ;;  %v1910_v55 = vrot.slane %v1909_v22, 4  ;;  %v1356_v11 = vcombine.high %v844_v10, %v844_v10  ;;  %v2397_v56 = vrot.slane %v4022_v33, 1 }
 0x223   : > { %v2417_v4 = vmax.f32 %v2415_v50, %v2416_v1  ;;  %v1892_v32 = vmax.f32 %v1890_v21, %v1891_v53  ;;  %v1898_v20 = vrot.slane %v1897_v5, 2  ;;  %v2404_v12 = vrot.slane %v4026_v31, 1 }
 0x224   : > { %v1905_v18 = vrot.slane %v1904_v36, 2  ;;  %v1911_v0 = vmax.f32 %v1909_v22, %v1910_v55  ;;  %v1363_v63 = vrot.slane %v844_v10, %v3350_v58  ;;  %v2411_v34 = vrot.slane %v4029_v15, 1 }
 0x225   : > { %v1893_v30 = vrot.slane %v1892_v32, 1  ;;  %v1899_v2 = vmax.f32 %v1897_v5, %v1898_v20  ;;  %v1370_v9 = vrot.slane %v1356_v11, %v3350_v58  ;;  %v2418_v24 = vrot.slane %v2417_v4, 1 }
 0x226   : > { %v1906_v35 = vmax.f32 %v1904_v36, %v1905_v18  ;;  %v1912_v37 = vrot.slane %v1911_v0, 2  ;;  %v1371_v62 = vcombine.high %v1363_v63, %v1363_v63  ;;  %v2336_v14 = vsel %vm381_vm0, %v1363_v63, -inf }
 0x227   : > { %v1894_v41 = vmax.f32 %v1892_v32, %v1893_v30  ;;  %v1900_v46 = vrot.slane %v1899_v2, 1  ;;  %v1372_v44 = vcombine.high %v1370_v9, %v1370_v9  ;;  %v2337_v28 = vrot.slane %v2336_v14, 4 }
 0x228   : > { %v1907_v29 = vrot.slane %v1906_v35, 1  ;;  %v1913_v17 = vmax.f32 %v1911_v0, %v1912_v37  ;;  %v2343_v40 = vsel %vm381_vm0, %v1371_v62, -inf  ;;  %v2350_v49 = vsel %vm381_vm0, %v1370_v9, -inf }
 0x229   : > { %v1901_v45 = vmax.f32 %v1899_v2, %v1900_v46  ;;  %v2472_v48 = vmax.f32 %v1894_v41, %v4013_v7  ;;  %v2338_v43 = vmax.f32 %v2336_v14, %v2337_v28  ;;  %v2344_v16 = vrot.slane %v2343_v40, 4 }
 0x22a   : > { %v1908_v38 = vmax.f32 %v1906_v35, %v1907_v29  ;;  %v1914_v50 = vrot.slane %v1913_v17, 1  ;;  %v2351_v57 = vrot.slane %v2350_v49, 4  ;;  %v2357_v6 = vsel %vm381_vm0, %v1372_v44, -inf  ;;  %v3070_v29 = vld [vmem:[%s4167_s3] ss:$0 sm:$0xff] }
 0x22b   : > { %v2473_v42 = vmax.f32 %v1901_v45, %v1957_v39  ;;  %v2339_v13 = vrot.slane %v2338_v43, 2  ;;  %v2345_v60 = vmax.f32 %v2343_v40, %v2344_v16  ;;  %v2358_v26 = vrot.slane %v2357_v6, 4 }
 0x22c   : > { %v1915_v8 = vmax.f32 %v1913_v17, %v1914_v50  ;;  %v2474_v10 = vmax.f32 %v1908_v38, %v1964_v51  ;;  %v2352_v1 = vmax.f32 %v2350_v49, %v2351_v57  ;;  %v831_v39 = vmul.f32 %v4020_v59, %v3834_v27 }
 0x22d   : > { %v2604_v21 = vsel %vm2576_vm2, %v2473_v42, %v2472_v48  ;;  %v2340_v54 = vmax.f32 %v2338_v43, %v2339_v13  ;;  %v2346_v52 = vrot.slane %v2345_v60, 2  ;;  %v2359_v7 = vmax.f32 %v2357_v6, %v2358_v26 }
 0x22e   : > { %v2475_v22 = vmax.f32 %v1915_v8, %v4033_v61  ;;  %v2605_v53 = vsel %vm2578_vm3, %v2474_v10, %v2604_v21  ;;  %v2353_v5 = vrot.slane %v2352_v1, 2  ;;  %v2398_v36 = vmax.f32 %v4022_v33, %v2397_v56 }
 0x22f   : > { %v2341_v55 = vrot.slane %v2340_v54, 1  ;;  %v2347_v11 = vmax.f32 %v2345_v60, %v2346_v52  ;;  %v2360_v32 = vrot.slane %v2359_v7, 2  ;;  %v2405_v20 = vmax.f32 %v4026_v31, %v2404_v12  ;;  %v3069_v31 = vld [vmem:[%s4166_s2] ss:$0 sm:$0xff] }
 0x230   : > { %v2354_v51 = vmax.f32 %v2352_v1, %v2353_v5  ;;  %v2412_v30 = vmax.f32 %v4029_v15, %v2411_v34  ;;  %v2419_v61 = vmax.f32 %v2417_v4, %v2418_v24  ;;  %v1135_v9 = vcombine.high %v831_v39, %v831_v39 }
 0x231   : > { %v2342_v18 = vmax.f32 %v2340_v54, %v2341_v55  ;;  %v2348_v0 = vrot.slane %v2347_v11, 1  ;;  %v2361_v63 = vmax.f32 %v2359_v7, %v2360_v32  ;;  %v751_v27 = vadd.f32 1.0, %v4024_v3 }
 0x232   : > { %v2355_v2 = vrot.slane %v2354_v51, 1  ;;  %v1142_v14 = vrot.slane %v831_v39, %v3350_v58  ;;  %v582_v12 = vmul.f32 %v3069_v31, %v3765_v47  ;;  %v1149_v41 = vrot.slane %v1135_v9, %v3350_v58 }
 0x233   : > { %v2349_v35 = vmax.f32 %v2347_v11, %v2348_v0  ;;  %v2362_v37 = vrot.slane %v2361_v63, 1  ;;  %v2504_v62 = vmax.f32 %v2342_v18, %v2398_v36  ;;  %3059 = vrcp.f32 %v751_v27 }
 0x234   : > { %v2356_v59 = vmax.f32 %v2354_v51, %v2355_v2  ;;  %v733_v46 = vadd.f32 1.0, %v4031_v23  ;;  %v1150_v44 = vcombine.high %v1142_v14, %v1142_v14  ;;  %v4064_v28 = vsel %vm2580_vm4, %v2475_v22, %v2605_v53 }
 0x235   : > { %v2363_v33 = vmax.f32 %v2361_v63, %v2362_v37  ;;  %v2505_v56 = vmax.f32 %v2349_v35, %v2405_v20  ;;  %v4069_v47 = vadd.f32 %v3070_v29, %v582_v12  ;;  %v1151_v40 = vcombine.high %v1149_v41, %v1149_v41 }
 0x236   : > { %v2506_v15 = vmax.f32 %v2356_v59, %v2412_v30  ;;  %3061 = vrcp.f32 %v733_v46  ;;  %v1972_v49 = vsel %vm381_vm0, %v1142_v14, -inf  ;;  %v1979_v45 = vsel %vm381_vm0, %v1150_v44, -inf }
 0x237   : > { %v2507_v4 = vmax.f32 %v2363_v33, %v2419_v61  ;;  %v2632_v34 = vsel %vm2576_vm2, %v2505_v56, %v2504_v62  ;;  %v1986_v23 = vsel %vm381_vm0, %v1149_v41, -inf  ;;  %v2804_v48 = vmul.f32 -1.442695, %v4069_v47 }
 0x238   : > { %v2633_v3 = vsel %vm2578_vm3, %v2506_v15, %v2632_v34  ;;  %v1973_v43 = vrot.slane %v1972_v49, 4  ;;  %v1993_v16 = vsel %vm381_vm0, %v1151_v40, -inf  ;;  %v1980_v38 = vrot.slane %v1979_v45, 4 }
 0x239   : > { %v4072_v17 = vsel %vm2580_vm4, %v2507_v4, %v2633_v3  ;;  %v1987_v50 = vrot.slane %v1986_v23, 4  ;;  %3063 = vpow2.f32 %v2804_v48  ;;  %v1994_v42 = vrot.slane %v1993_v16, 4 }
 0x23a   : > { %v1974_v6 = vmax.f32 %v1972_v49, %v1973_v43  ;;  %v1981_v60 = vmax.f32 %v1979_v45, %v1980_v38 }
 0x23b   : > { %v1988_v26 = vmax.f32 %v1986_v23, %v1987_v50  ;;  %v1995_v1 = vmax.f32 %v1993_v16, %v1994_v42 }
 0x23c   : > { %v1975_v10 = vrot.slane %v1974_v6, 2  ;;  %v1982_v54 = vrot.slane %v1981_v60, 2 }
 0x23d   : > { %v3060_v57 = vpop.eup %3059  ;;  %v1989_v52 = vrot.slane %v1988_v26, 2  ;;  %v1996_v39 = vrot.slane %v1995_v1, 2 }
 0x23e   : > { %v847_v24 = vmul.f32 %v3060_v57, %v3942_v25  ;;  %v1976_v5 = vmax.f32 %v1974_v6, %v1975_v10  ;;  %v1983_v51 = vmax.f32 %v1981_v60, %v1982_v54 }
 0x23f   : > { %v1990_v20 = vmax.f32 %v1988_v26, %v1989_v52  ;;  %v1997_v9 = vmax.f32 %v1995_v1, %v1996_v39 }
 0x240   : > { %v3062_v13 = vpop.eup %3061  ;;  %v1407_v7 = vcombine.high %v847_v24, %v847_v24  ;;  %v1414_v36 = vrot.slane %v847_v24, %v3350_v58  ;;  %v1977_v2 = vrot.slane %v1976_v5, 1  ;;  %v1984_v56 = vrot.slane %v1983_v51, 1 }
 0x241   : > { %v829_v8 = vmul.f32 %v3062_v13, %v3945_v19  ;;  %v1991_v14 = vrot.slane %v1990_v20, 1  ;;  %v1998_v3 = vrot.slane %v1997_v9, 1 }
 0x242   : > { %v1421_v18 = vrot.slane %v1407_v7, %v3350_v58  ;;  %v1422_v35 = vcombine.high %v1414_v36, %v1414_v36  ;;  %v2420_v12 = vsel %vm381_vm0, %v1414_v36, -inf  ;;  %v1978_v23 = vmax.f32 %v1976_v5, %v1977_v2 }
 0x243   : > { %v1101_v21 = vcombine.high %v829_v8, %v829_v8  ;;  %v1108_v22 = vrot.slane %v829_v8, %v3350_v58  ;;  %v3064_v55 = vpop.eup %3063  ;;  %v1992_v48 = vmax.f32 %v1990_v20, %v1991_v14  ;;  %v2421_v43 = vrot.slane %v2420_v12, 4 }
 0x244   : > { %v749_v37 = vadd.f32 1.0, %v3064_v55  ;;  %v1423_v31 = vcombine.high %v1421_v18, %v1421_v18  ;;  %v2427_v46 = vsel %vm381_vm0, %v1422_v35, -inf  ;;  %v2434_v44 = vsel %vm381_vm0, %v1421_v18, -inf }
 0x245   : > { %v1115_v53 = vrot.slane %v1101_v21, %v3350_v58  ;;  %v1116_v11 = vcombine.high %v1108_v22, %v1108_v22  ;;  %v1916_v25 = vsel %vm381_vm0, %v1108_v22, -inf  ;;  %v1985_v42 = vmax.f32 %v1983_v51, %v1984_v56 }
 0x246   : > { %v1917_v0 = vrot.slane %v1916_v25, 4  ;;  %3065 = vrcp.f32 %v749_v37  ;;  %v2441_v16 = vsel %vm381_vm0, %v1423_v31, -inf  ;;  %v1999_v13 = vmax.f32 %v1997_v9, %v1998_v3 }
 0x247   : > { %v1117_v32 = vcombine.high %v1115_v53, %v1115_v53  ;;  %v1930_v19 = vsel %vm381_vm0, %v1115_v53, -inf  ;;  %v1923_v63 = vsel %vm381_vm0, %v1116_v11, -inf  ;;  %v2428_v60 = vrot.slane %v2427_v46, 4 }
 0x248   : > { %v1931_v30 = vrot.slane %v1930_v19, 4  ;;  %v1918_v62 = vmax.f32 %v1916_v25, %v1917_v0  ;;  %v1924_v27 = vrot.slane %v1923_v63, 4  ;;  %v2435_v26 = vrot.slane %v2434_v44, 4 }
 0x249   : > { %v1937_v61 = vsel %vm381_vm0, %v1117_v32, -inf  ;;  %v2422_v21 = vmax.f32 %v2420_v12, %v2421_v43  ;;  %v2442_v54 = vrot.slane %v2441_v16, 4  ;;  %v2429_v5 = vmax.f32 %v2427_v46, %v2428_v60 }
 0x24a   : > { %v1932_v59 = vmax.f32 %v1930_v19, %v1931_v30  ;;  %v1938_v33 = vrot.slane %v1937_v61, 4  ;;  %v1919_v15 = vrot.slane %v1918_v62, 2  ;;  %v1925_v4 = vmax.f32 %v1923_v63, %v1924_v27 }
 0x24b   : > { %v2436_v39 = vmax.f32 %v2434_v44, %v2435_v26  ;;  %v2423_v25 = vrot.slane %v2422_v21, 2  ;;  %v2443_v19 = vmax.f32 %v2441_v16, %v2442_v54  ;;  %v2430_v18 = vrot.slane %v2429_v5, 2 }
 0x24c   : > { %v1933_v34 = vrot.slane %v1932_v59, 2  ;;  %v1939_v41 = vmax.f32 %v1937_v61, %v1938_v33  ;;  %v1920_v29 = vmax.f32 %v1918_v62, %v1919_v15  ;;  %v1926_v40 = vrot.slane %v1925_v4, 2 }
 0x24d   : > { %v2437_v63 = vrot.slane %v2436_v39, 2  ;;  %v2424_v9 = vmax.f32 %v2422_v21, %v2423_v25  ;;  %v2444_v35 = vrot.slane %v2443_v19, 2  ;;  %v2431_v27 = vmax.f32 %v2429_v5, %v2430_v18 }
 0x24e   : > { %v1934_v49 = vmax.f32 %v1932_v59, %v1933_v34  ;;  %v1940_v45 = vrot.slane %v1939_v41, 2  ;;  %v1921_v38 = vrot.slane %v1920_v29, 1  ;;  %v1927_v50 = vmax.f32 %v1925_v4, %v1926_v40 }
 0x24f   : > { %v2425_v4 = vrot.slane %v2424_v9, 1  ;;  %v2445_v34 = vmax.f32 %v2443_v19, %v2444_v35 }
 0x250   : > { %v1935_v57 = vrot.slane %v1934_v49, 1  ;;  %v1941_v6 = vmax.f32 %v1939_v41, %v1940_v45  ;;  %v1922_v24 = vmax.f32 %v1920_v29, %v1921_v38  ;;  %v1928_v8 = vrot.slane %v1927_v50, 1  ;;  %v3066_v32 = vpop.eup %3065 }
 0x251   : > { %v845_v20 = vmul.f32 %v3066_v32, %v4069_v47  ;;  %v2438_v47 = vmax.f32 %v2436_v39, %v2437_v63  ;;  %v2432_v29 = vrot.slane %v2431_v27, 1  ;;  %v2426_v43 = vmax.f32 %v2424_v9, %v2425_v4 }
 0x252   : > { %v1936_v10 = vmax.f32 %v1934_v49, %v1935_v57  ;;  %v1942_v1 = vrot.slane %v1941_v6, 1  ;;  %v1929_v52 = vmax.f32 %v1927_v50, %v1928_v8  ;;  %v2476_v22 = vmax.f32 %v1922_v24, %v1978_v23 }
 0x253   : > { %v1373_v61 = vcombine.high %v845_v20, %v845_v20  ;;  %v1380_v2 = vrot.slane %v845_v20, %v3350_v58  ;;  %v2439_v40 = vrot.slane %v2438_v47, 1  ;;  %v2446_v16 = vrot.slane %v2445_v34, 1 }
 0x254   : > { %v1943_v7 = vmax.f32 %v1941_v6, %v1942_v1  ;;  %v2478_v53 = vmax.f32 %v1936_v10, %v1992_v48  ;;  %v2477_v36 = vmax.f32 %v1929_v52, %v1985_v42  ;;  %v2607_v11 = vsel %vm2582_vm5, %v2476_v22, %v4064_v28 }
 0x255   : > { %v1387_v28 = vrot.slane %v1373_v61, %v3350_v58  ;;  %v1388_v37 = vcombine.high %v1380_v2, %v1380_v2  ;;  %v2364_v62 = vsel %vm381_vm0, %v1380_v2, -inf  ;;  %v2433_v42 = vmax.f32 %v2431_v27, %v2432_v29 }
 0x256   : > { %v2479_v55 = vmax.f32 %v1943_v7, %v1999_v13  ;;  %v2608_v51 = vsel %vm2584_vm6, %v2477_v36, %v2607_v11  ;;  %v2365_v59 = vrot.slane %v2364_v62, 4  ;;  %v2440_v13 = vmax.f32 %v2438_v47, %v2439_v40 }
 0x257   : > { %v2609_v0 = vsel %vm2586_vm7, %v2478_v53, %v2608_v51  ;;  %v1389_v33 = vcombine.high %v1387_v28, %v1387_v28  ;;  %v2371_v56 = vsel %vm381_vm0, %v1388_v37, -inf  ;;  %v2378_v14 = vsel %vm381_vm0, %v1387_v28, -inf }
 0x258   : > { %v2610_v30 = vsel %vm2588_vm8, %v2479_v55, %v2609_v0  ;;  %v2366_v31 = vmax.f32 %v2364_v62, %v2365_v59  ;;  %v2372_v12 = vrot.slane %v2371_v56, 4  ;;  %v2379_v15 = vrot.slane %v2378_v14, 4 }
 0x259   : > { %2650 = vst [vmem:[%s3559_s27 + $0x18] sm:$0xff] %v2610_v30  ;;  %v2385_v41 = vsel %vm381_vm0, %v1389_v33, -inf  ;;  %v2447_v10 = vmax.f32 %v2445_v34, %v2446_v16 }
 0x25a   : > { %v2367_v3 = vrot.slane %v2366_v31, 2  ;;  %v2373_v58 = vmax.f32 %v2371_v56, %v2372_v12  ;;  %v2380_v46 = vmax.f32 %v2378_v14, %v2379_v15  ;;  %v2386_v44 = vrot.slane %v2385_v41, 4 }
 0x25c   : > { %v2368_v49 = vmax.f32 %v2366_v31, %v2367_v3  ;;  %v2374_v45 = vrot.slane %v2373_v58, 2  ;;  %v2381_v23 = vrot.slane %v2380_v46, 2  ;;  %v2387_v48 = vmax.f32 %v2385_v41, %v2386_v44 }
 0x25e   : > { %v2369_v38 = vrot.slane %v2368_v49, 1  ;;  %v2375_v50 = vmax.f32 %v2373_v58, %v2374_v45  ;;  %v2382_v57 = vmax.f32 %v2380_v46, %v2381_v23  ;;  %v2388_v6 = vrot.slane %v2387_v48, 2 }
 0x260   : > { %v2370_v60 = vmax.f32 %v2368_v49, %v2369_v38  ;;  %v2376_v26 = vrot.slane %v2375_v50, 1  ;;  %v2383_v24 = vrot.slane %v2382_v57, 1  ;;  %v2389_v8 = vmax.f32 %v2387_v48, %v2388_v6 }
 0x262   : > { %v2377_v1 = vmax.f32 %v2375_v50, %v2376_v26  ;;  %v2384_v21 = vmax.f32 %v2382_v57, %v2383_v24  ;;  %v2390_v54 = vrot.slane %v2389_v8, 1  ;;  %v2508_v52 = vmax.f32 %v2370_v60, %v2426_v43 }
 0x264   : > { %v2391_v7 = vmax.f32 %v2389_v8, %v2390_v54  ;;  %v2509_v22 = vmax.f32 %v2377_v1, %v2433_v42  ;;  %v2510_v53 = vmax.f32 %v2384_v21, %v2440_v13  ;;  %v2635_v5 = vsel %vm2582_vm5, %v2508_v52, %v4072_v17 }
 0x266   : > { %v2511_v39 = vmax.f32 %v2391_v7, %v2447_v10  ;;  %v2636_v36 = vsel %vm2584_vm6, %v2509_v22, %v2635_v5 }
 0x267   : > { %v2637_v55 = vsel %vm2586_vm7, %v2510_v53, %v2636_v36 }
 0x268   : > { %v2638_v11 = vsel %vm2588_vm8, %v2511_v39, %v2637_v55 }
 0x269   : > { %2654 = vst [vmem:[%s3559_s27 + $0x38] sm:$0xff] %v2638_v11 }
 0x26a   : > { %3084 = shalt.err (!%p3081_p3)
}
 0x26b   : > { %s3085_s22 = scalar_lea.hbm %s4114_s14, 1024  ;;  %s3089_s5 = scalar_lea.hbm %s4168_s4, 2048 }
 0x26c   : > { %p3086_p4 = scmp.ne.s32.totalorder %s4114_s14, %s3085_s22  ;;  %p3090_p9 = scmp.lt.u32.totalorder %s4114_s14, %s4168_s4 }
 0x26d   : > { %p3091_p10 = scmp.lt.u32.totalorder %s3089_s5, %s3085_s22  ;;  %p3093_p12 = scmp.lt.u32.totalorder %s3085_s22, %s4114_s14 }
 0x26e   : > { %p3087_p7 = pnand %p3086_p4, %p3202_p5 }
 0x26f   : > { %p3092_p11 = por %p3091_p10, %p3090_p9 }
 0x270   : > { %p3088_p8 = pneg %p3087_p7 }
 0x271   : > { %p3094_p13 = por %p3093_p12, %p3092_p11 }
 0x273   : > { %p3095_p0 = pnand %p3094_p13, %p3088_p8 }
 0x275   : > { %3098 = shalt.err (!%p3095_p0)
}
 0x276   : > { %s3137_s8 = smov 128   ;;  %s3138_s9 = smov 8  }
 0x277   : > { %2878 = dma.vmem_to_hbm [thread:$0]  (%p3202_p5), %s4116_s11, 1024, %s4114_s14, %s4123_s19, %s3137_s8, %s3137_s8, %s3138_s9  }
 0x278 PF: > { %p2884_p1 = scmp.ge.s32.totalorder %s3133_s18, 2  ;;  %s2684_s10 = sand.u32 1, %s3121_s15  }
 0x279   : > { %s2685_s12 = scalar_lea.sflag [#allocation3], %s2684_s10 }
 0x27a   : > { %p2881_p2 = pnand %p2884_p1, %p3206_p6 }
 0x27c   : > { %3116 = dma.done.wait (!%p2881_p2), %s2685_s12, 1024  }
 0x27d   : > { %3118 = vsyncadd (!%p2881_p2), %s2685_s12, 4294966272  ;;  %p14_p3 = scmp.ge.s32.totalorder %s3189_s21, 4   ;;  %s4183_s15 = smov %s3125_s16 }
 0x27e   : > { %s4184_s16 = smov %s3129_s17  ;;  %s4185_s17 = smov %s3200_s24 }
 0x27f   : > { %s4186_s18 = smov %s3189_s21  ;;  %16 = sbr.rel (!%p14_p3) target bundleno = 3 (0x3), region = 71 }
 0x286   :  { %2690 = vsyncpa [#allocation3], 1 }
 0x287   :  { %2692 = vsyncpa [#allocation3 + $0x1], 1 }

</bundles_post_ra>
